<compile_context>
chip_gen: v5e
topology: v5e:2x2
jax: 0.10.0
libtpu: 0.0.40
codegen_flags: <defaults>
</compile_context>

<pallas_src>
import jax
import jax.numpy as jnp
import numpy as np
from jax import lax
from jax.experimental import pallas as pl
from jax.experimental.pallas import tpu as pltpu

EPS = 1e-5


# --------------------------------------------------------------------------- #
# Kernel
# --------------------------------------------------------------------------- #
def _bottleneck_kernel(x_ref, w1_ref, b1_ref, w2_ref, b2_ref, w3_ref, b3_ref,
                       out_ref):
    H, W, Cin = x_ref.shape          # whole image, resident in VMEM
    HT = out_ref.shape[0]            # rows produced by this grid step
    Cout = out_ref.shape[2]
    P = w1_ref.shape[1]
    cdt = x_ref.dtype                # compute dtype (bf16)

    h = pl.program_id(1)
    nh = pl.num_programs(1)
    row0 = pl.multiple_of(h * HT, HT)

    # ---- input slab with 1-row halo (zeros at image top/bottom) ----------- #
    top_idx = jnp.maximum(row0 - 1, 0)
    bot_idx = jnp.minimum(row0 + HT, H - 1)
    top = x_ref[pl.ds(top_idx, 1)] * jnp.where(h == 0, 0, 1).astype(cdt)
    bot = x_ref[pl.ds(bot_idx, 1)] * jnp.where(h == nh - 1, 0, 1).astype(cdt)
    center = x_ref[pl.ds(row0, HT)]
    slab = jnp.concatenate([top, center, bot], axis=0)       # (HT+2, W, Cin)

    # ---- conv1 (1x1, BN folded) + ReLU, recomputed on the 2 halo rows ----- #
    t1 = jnp.dot(slab.reshape((HT + 2) * W, Cin), w1_ref[...],
                 preferred_element_type=jnp.float32)
    t1 = jnp.maximum(t1 + b1_ref[...], 0.0).astype(cdt)
    t1 = t1.reshape(HT + 2, W, P)

    # ---- conv2 (3x3, stride 1, pad 1, BN folded) as 9 accumulated matmuls - #
    # Taps grouped by kx: u[kx][y, x] = sum_ky t1[y+ky, x] @ w2[ky, kx];
    # out2[y, x] = u[1][y, x] + u[0][y, x-1] + u[2][y, x+1].
    rows = [t1[ky:ky + HT].reshape(HT * W, P) for ky in range(3)]
    u = []
    for kx in range(3):
        acc = jnp.dot(rows[0], w2_ref[kx], preferred_element_type=jnp.float32)
        for ky in (1, 2):
            acc = acc + jnp.dot(rows[ky], w2_ref[3 * ky + kx],
                                preferred_element_type=jnp.float32)
        u.append(acc.reshape(HT, W, P))
    zcol = jnp.zeros((HT, 1, P), jnp.float32)
    y2 = (u[1]
          + jnp.concatenate([zcol, u[0][:, :W - 1, :]], axis=1)
          + jnp.concatenate([u[2][:, 1:, :], zcol], axis=1))
    y2 = y2.reshape(HT * W, P)
    y2 = jnp.maximum(y2 + b2_ref[...], 0.0).astype(cdt)

    # ---- conv3 (1x1, BN folded) + identity residual + ReLU ---------------- #
    t3 = jnp.dot(y2, w3_ref[...], preferred_element_type=jnp.float32)
    t3 = t3 + b3_ref[...]
    residual = x_ref[pl.ds(row0, HT)].reshape(HT * W, Cin).astype(jnp.float32)
    out = jnp.maximum(t3 + residual, 0.0)
    out_ref[...] = out.reshape(HT, W, Cout).astype(out_ref.dtype)


# --------------------------------------------------------------------------- #
# Wrappers
# --------------------------------------------------------------------------- #
def _pick_h_tile(H):
    if H % 8 == 0 and H > 8:
        return 8
    for cand in range(min(H, 16), 0, -1):
        if H % cand == 0:
            return cand
    return H


def bottleneck_nhwc(x, folded, *, out_dtype=jnp.bfloat16, h_tile=None):
    """Fused Bottleneck forward, NHWC in / NHWC out (identity residual).

    NHWC + bf16 output is the fast path for chaining blocks.  The residual is
    added from the bf16-cast input (small precision loss vs. the f32 PyTorch
    reference; acceptable for inference).
    """
    N, H, W, Cin = x.shape
    P = folded['w1'].shape[1]
    Cout = folded['w3'].shape[1]
    assert Cin == Cout, (
        "identity residual requires inplanes == planes*4 (downsample=None)")

    compute_dtype = folded['w1'].dtype
    x = x.astype(compute_dtype)

    HT = h_tile if h_tile is not None else _pick_h_tile(H)
    assert H % HT == 0, f"h_tile {HT} must divide H {H}"
    NH = H // HT

    in_specs = [
        # Whole image, constant over h -> DMA'd once per image, halo rows are
        # re-sliced from VMEM.
        pl.BlockSpec((None, H, W, Cin), lambda n, h: (n, 0, 0, 0)),
        pl.BlockSpec(folded['w1'].shape, lambda n, h: (0, 0)),
        pl.BlockSpec(folded['b1'].shape, lambda n, h: (0, 0)),
        pl.BlockSpec(folded['w2'].shape, lambda n, h: (0, 0, 0)),
        pl.BlockSpec(folded['b2'].shape, lambda n, h: (0, 0)),
        pl.BlockSpec(folded['w3'].shape, lambda n, h: (0, 0)),
        pl.BlockSpec(folded['b3'].shape, lambda n, h: (0, 0)),
    ]
    out_spec = pl.BlockSpec((None, HT, W, Cout), lambda n, h: (n, h, 0, 0))

    act_b = np.dtype(compute_dtype).itemsize
    out_b = np.dtype(out_dtype).itemsize
    w_bytes = sum(int(v.size) * v.dtype.itemsize for v in folded.values())

    # Rough per-core VMEM demand: double-buffered image + out tile, weights
    # (default 2 buffers), f32/bf16 temporaries of one step.
    need = (2 * H * W * Cin * act_b
            + 2 * HT * W * Cout * out_b
            + 2 * w_bytes
            + (HT + 2) * W * (Cin + P) * act_b
            + HT * W * (4 * P + Cout) * 4)
    try:
        cap = int(getattr(pltpu.get_tpu_info(), "vmem_capacity_bytes",
                          64 * 2**20))
    except Exception:
        cap = 64 * 2**20
    vmem_limit = int(min(0.75 * cap, max(need + (8 << 20), 24 << 20)))

    flops = 2 * N * H * W * (Cin * P + 9 * P * P + P * Cout)
    bytes_accessed = int(N * H * W * (Cin * act_b + Cout * out_b) + w_bytes)

    return pl.pallas_call(
        _bottleneck_kernel,
        out_shape=jax.ShapeDtypeStruct((N, H, W, Cout), out_dtype),
        grid_spec=pltpu.PrefetchScalarGridSpec(
            num_scalar_prefetch=0,
            grid=(N, NH),
            in_specs=in_specs,
            out_specs=out_spec,
        ),
        compiler_params=pltpu.CompilerParams(
            dimension_semantics=("parallel", "parallel"),
            vmem_limit_bytes=vmem_limit),
        cost_estimate=pl.CostEstimate(flops=flops, transcendentals=0,
                                      bytes_accessed=bytes_accessed),
    )(x, folded['w1'], folded['b1'], folded['w2'], folded['b2'],
      folded['w3'], folded['b3'])


def bottleneck_forward_nchw(x_nchw, folded, *, out_dtype=jnp.bfloat16):
    """PyTorch-style NCHW boundary wrapper around the NHWC kernel (demo only;
    chain bottleneck_nhwc directly to avoid the relayouts)."""
    x = jnp.transpose(x_nchw, (0, 2, 3, 1))
    y = bottleneck_nhwc(x, folded, out_dtype=out_dtype)
    return jnp.transpose(y, (0, 3, 1, 2))


# --------------------------------------------------------------------------- #
# Parameters: raw (conv weights + BN stats) and folded (BN baked into weights)
# --------------------------------------------------------------------------- #
def make_raw_params(key, inplanes, planes):
    cout = planes * 4
    ks = jax.random.split(key, 15)

    def conv_init(k, shape, fan_in):
        return jax.random.normal(k, shape, jnp.float32) / jnp.sqrt(fan_in)

    def bn_init(k0, k1, k2, k3, c):
        g = 1.0 + 0.1 * jax.random.normal(k0, (c,), jnp.float32)
        b = 0.1 * jax.random.normal(k1, (c,), jnp.float32)
        m = 0.05 * jax.random.normal(k2, (c,), jnp.float32)
        v = jax.random.uniform(k3, (c,), jnp.float32, minval=0.5, maxval=1.5)
        return g, b, m, v

    w1 = conv_init(ks[0], (inplanes, planes), inplanes)        # 1x1 as (Cin, P)
    w2 = conv_init(ks[1], (3, 3, planes, planes), 9 * planes)  # HWIO
    w3 = conv_init(ks[2], (planes, cout), planes)              # 1x1 as (P, 4P)
    g1, beta1, m1, v1 = bn_init(ks[3], ks[4], ks[5], ks[6], planes)
    g2, beta2, m2, v2 = bn_init(ks[7], ks[8], ks[9], ks[10], planes)
    g3, beta3, m3, v3 = bn_init(ks[11], ks[12], ks[13], ks[14], cout)
    return dict(w1=w1, w2=w2, w3=w3,
                g1=g1, beta1=beta1, m1=m1, v1=v1,
                g2=g2, beta2=beta2, m2=m2, v2=v2,
                g3=g3, beta3=beta3, m3=m3, v3=v3)


def fold_params(raw, *, compute_dtype=jnp.bfloat16, eps=EPS):
    """Fold inference BatchNorm into the conv weights; biases stay f32."""
    def bn_fold(g, b, m, v):
        s = g / jnp.sqrt(v + eps)
        return s, b - m * s

    s1, b1 = bn_fold(raw['g1'], raw['beta1'], raw['m1'], raw['v1'])
    s2, b2 = bn_fold(raw['g2'], raw['beta2'], raw['m2'], raw['v2'])
    s3, b3 = bn_fold(raw['g3'], raw['beta3'], raw['m3'], raw['v3'])
    P = raw['w1'].shape[1]
    w1f = (raw['w1'] * s1[None, :]).astype(compute_dtype)
    # (3,3,P,P) HWIO -> (9, P, P); tap index k = ky*3 + kx matches the kernel.
    w2f = (raw['w2'] * s2[None, None, None, :]).reshape(9, P, P)
    w2f = w2f.astype(compute_dtype)
    w3f = (raw['w3'] * s3[None, :]).astype(compute_dtype)
    return dict(w1=w1f, b1=b1.reshape(1, -1).astype(jnp.float32),
                w2=w2f, b2=b2.reshape(1, -1).astype(jnp.float32),
                w3=w3f, b3=b3.reshape(1, -1).astype(jnp.float32))


# --------------------------------------------------------------------------- #
# Pure-JAX reference (original module semantics, f32, un-folded BN)
# --------------------------------------------------------------------------- #
def reference_nhwc(x, raw, eps=EPS):
    dn = ('NHWC', 'HWIO', 'NHWC')

    def bn(y, g, b, m, v):
        return (y - m) / jnp.sqrt(v + eps) * g + b

    y = lax.conv_general_dilated(x, raw['w1'][None, None], (1, 1), 'VALID',
                                 dimension_numbers=dn)
    y = jnp.maximum(bn(y, raw['g1'], raw['beta1'], raw['m1'], raw['v1']), 0.0)
    y = lax.conv_general_dilated(y, raw['w2'], (1, 1), ((1, 1), (1, 1)),
                                 dimension_numbers=dn)
    y = jnp.maximum(bn(y, raw['g2'], raw['beta2'], raw['m2'], raw['v2']), 0.0)
    y = lax.conv_general_dilated(y, raw['w3'][None, None], (1, 1), 'VALID',
                                 dimension_numbers=dn)
    y = bn(y, raw['g3'], raw['beta3'], raw['m3'], raw['v3'])
    return jnp.maximum(y + x, 0.0)


# --------------------------------------------------------------------------- #
if __name__ == "__main__":
    # identity residual config: inplanes == planes * expansion
    inplanes, planes = 16, 4
    N, H, W = 2, 16, 16

    key = jax.random.PRNGKey(0)
    k_x, k_p = jax.random.split(key)
    x_nchw = jax.random.normal(k_x, (N, inplanes, H, W), jnp.float32)
    raw = make_raw_params(k_p, inplanes, planes)
    folded = fold_params(raw)

    out = bottleneck_forward_nchw(x_nchw, folded)
    out = jax.block_until_ready(out)

    # validate against the full-precision reference (bf16 matmuls + bf16
    # output => relaxed tolerance)
    x_nhwc = jnp.transpose(x_nchw, (0, 2, 3, 1))
    ref = jnp.transpose(reference_nhwc(x_nhwc, raw), (0, 3, 1, 2))
    assert out.shape == (N, inplanes, H, W)
    out_f32 = out.astype(jnp.float32)
    max_err = float(jnp.max(jnp.abs(out_f32 - ref)))
    assert jnp.allclose(out_f32, ref, atol=5e-2, rtol=5e-2), \
        f"max abs err {max_err}"

    print("KERNEL_OK")
</pallas_src>

<mosaic_0001>
module attributes {stable_mosaic.version = 11 : i64} {
  func.func @_bottleneck_kernel(%arg0: i32, %arg1: i32, %arg2: memref<1x16x16x16xbf16, #tpu.memory_space<vmem>>, %arg3: memref<16x4xbf16, #tpu.memory_space<vmem>>, %arg4: memref<1x4xf32, #tpu.memory_space<vmem>>, %arg5: memref<9x4x4xbf16, #tpu.memory_space<vmem>>, %arg6: memref<1x4xf32, #tpu.memory_space<vmem>>, %arg7: memref<4x16xbf16, #tpu.memory_space<vmem>>, %arg8: memref<1x16xf32, #tpu.memory_space<vmem>>, %arg9: memref<1x8x16x16xbf16, #tpu.memory_space<vmem>>) attributes {dimension_semantics = [#tpu.dimension_semantics<parallel>, #tpu.dimension_semantics<parallel>], iteration_bounds = array<i64: 2, 2>, scalar_prefetch = 0 : i64, scratch_operands = 0 : i64, tpu.core_type = #tpu.core_type<tc>, window_params = [{transform_indices = @transform_0, window_bounds = array<i64: 1, 16, 16, 16>}, {pipeline_mode = #tpu.pipeline_mode<synchronous>, transform_indices = @transform_1, window_bounds = array<i64: 16, 4>}, {pipeline_mode = #tpu.pipeline_mode<synchronous>, transform_indices = @transform_2, window_bounds = array<i64: 1, 4>}, {pipeline_mode = #tpu.pipeline_mode<synchronous>, transform_indices = @transform_3, window_bounds = array<i64: 9, 4, 4>}, {pipeline_mode = #tpu.pipeline_mode<synchronous>, transform_indices = @transform_4, window_bounds = array<i64: 1, 4>}, {pipeline_mode = #tpu.pipeline_mode<synchronous>, transform_indices = @transform_5, window_bounds = array<i64: 4, 16>}, {pipeline_mode = #tpu.pipeline_mode<synchronous>, transform_indices = @transform_6, window_bounds = array<i64: 1, 16>}, {transform_indices = @transform_7, window_bounds = array<i64: 1, 8, 16, 16>}]} {
    %c8_i32 = arith.constant 8 : i32
    %0 = arith.muli %arg1, %c8_i32 : i32
    %1 = tpu.assume_multiple %0, 8 : i32
    %c1_i32 = arith.constant 1 : i32
    %2 = arith.subi %1, %c1_i32 : i32
    %c0_i32 = arith.constant 0 : i32
    %3 = arith.maxsi %2, %c0_i32 : i32
    %c8_i32_0 = arith.constant 8 : i32
    %4 = arith.addi %1, %c8_i32_0 : i32
    %c15_i32 = arith.constant 15 : i32
    %5 = arith.minsi %4, %c15_i32 : i32
    %c0 = arith.constant 0 : index
    %6 = arith.index_cast %3 : i32 to index
    %c0_1 = arith.constant 0 : index
    %c0_2 = arith.constant 0 : index
    %7 = vector.load %arg2[%c0, %6, %c0_1, %c0_2] : memref<1x16x16x16xbf16, #tpu.memory_space<vmem>>, vector<1x1x16x16xbf16>
    %8 = vector.shape_cast %7 : vector<1x1x16x16xbf16> to vector<1x16x16xbf16>
    %c0_i32_3 = arith.constant 0 : i32
    %9 = arith.cmpi eq, %arg1, %c0_i32_3 : i32
    %c0_i32_4 = arith.constant 0 : i32
    %c1_i32_5 = arith.constant 1 : i32
    %10 = arith.select %9, %c0_i32_4, %c1_i32_5 : i32
    %11 = arith.sitofp %10 : i32 to bf16
    %12 = vector.broadcast %11 : bf16 to vector<1x16x16xbf16>
    %13 = arith.mulf %8, %12 : vector<1x16x16xbf16>
    %c0_6 = arith.constant 0 : index
    %14 = arith.index_cast %5 : i32 to index
    %c0_7 = arith.constant 0 : index
    %c0_8 = arith.constant 0 : index
    %15 = vector.load %arg2[%c0_6, %14, %c0_7, %c0_8] : memref<1x16x16x16xbf16, #tpu.memory_space<vmem>>, vector<1x1x16x16xbf16>
    %16 = vector.shape_cast %15 : vector<1x1x16x16xbf16> to vector<1x16x16xbf16>
    %c1_i32_9 = arith.constant 1 : i32
    %17 = arith.cmpi eq, %arg1, %c1_i32_9 : i32
    %c0_i32_10 = arith.constant 0 : i32
    %c1_i32_11 = arith.constant 1 : i32
    %18 = arith.select %17, %c0_i32_10, %c1_i32_11 : i32
    %19 = arith.sitofp %18 : i32 to bf16
    %20 = vector.broadcast %19 : bf16 to vector<1x16x16xbf16>
    %21 = arith.mulf %16, %20 : vector<1x16x16xbf16>
    %c0_12 = arith.constant 0 : index
    %22 = arith.index_cast %1 : i32 to index
    %c0_13 = arith.constant 0 : index
    %c0_14 = arith.constant 0 : index
    %23 = vector.load %arg2[%c0_12, %22, %c0_13, %c0_14] : memref<1x16x16x16xbf16, #tpu.memory_space<vmem>>, vector<1x8x16x16xbf16>
    %24 = vector.shape_cast %23 : vector<1x8x16x16xbf16> to vector<8x16x16xbf16>
    %25 = tpu.concatenate %13, %24, %21 in 0 : vector<1x16x16xbf16>, vector<8x16x16xbf16>, vector<1x16x16xbf16> -> vector<10x16x16xbf16>
    %26 = vector.shape_cast %25 : vector<10x16x16xbf16> to vector<160x16xbf16>
    %c0_15 = arith.constant 0 : index
    %c0_16 = arith.constant 0 : index
    %27 = vector.load %arg3[%c0_15, %c0_16] : memref<16x4xbf16, #tpu.memory_space<vmem>>, vector<16x4xbf16>
    %cst = arith.constant dense<0.000000e+00> : vector<160x4xf32>
    %28 = tpu.matmul %26, %27, %cst {dimension_numbers = #tpu.dot_dimension_numbers<[1], [0], [0], [1], [0, 0, 1, 1], [], []>} : vector<160x16xbf16>, vector<16x4xbf16>, vector<160x4xf32> -> vector<160x4xf32>
    %c0_17 = arith.constant 0 : index
    %c0_18 = arith.constant 0 : index
    %29 = vector.load %arg4[%c0_17, %c0_18] : memref<1x4xf32, #tpu.memory_space<vmem>>, vector<1x4xf32>
    %30 = vector.broadcast %29 : vector<1x4xf32> to vector<160x4xf32>
    %31 = arith.addf %28, %30 : vector<160x4xf32>
    %cst_19 = arith.constant 0.000000e+00 : f32
    %32 = vector.broadcast %cst_19 : f32 to vector<160x4xf32>
    %33 = arith.maximumf %31, %32 : vector<160x4xf32>
    %34 = arith.truncf %33 : vector<160x4xf32> to vector<160x4xbf16>
    %35 = vector.shape_cast %34 : vector<160x4xbf16> to vector<10x16x4xbf16>
    %36 = vector.extract_strided_slice %35 {offsets = [0, 0, 0], sizes = [8, 16, 4], strides = [1, 1, 1]} : vector<10x16x4xbf16> to vector<8x16x4xbf16>
    %37 = vector.shape_cast %36 : vector<8x16x4xbf16> to vector<128x4xbf16>
    %38 = vector.extract_strided_slice %35 {offsets = [1, 0, 0], sizes = [8, 16, 4], strides = [1, 1, 1]} : vector<10x16x4xbf16> to vector<8x16x4xbf16>
    %39 = vector.shape_cast %38 : vector<8x16x4xbf16> to vector<128x4xbf16>
    %40 = vector.extract_strided_slice %35 {offsets = [2, 0, 0], sizes = [8, 16, 4], strides = [1, 1, 1]} : vector<10x16x4xbf16> to vector<8x16x4xbf16>
    %41 = vector.shape_cast %40 : vector<8x16x4xbf16> to vector<128x4xbf16>
    %c0_20 = arith.constant 0 : index
    %c0_21 = arith.constant 0 : index
    %c0_22 = arith.constant 0 : index
    %42 = vector.load %arg5[%c0_20, %c0_21, %c0_22] : memref<9x4x4xbf16, #tpu.memory_space<vmem>>, vector<1x4x4xbf16>
    %43 = vector.shape_cast %42 : vector<1x4x4xbf16> to vector<4x4xbf16>
    %cst_23 = arith.constant dense<0.000000e+00> : vector<128x4xf32>
    %44 = tpu.matmul %37, %43, %cst_23 {dimension_numbers = #tpu.dot_dimension_numbers<[1], [0], [0], [1], [0, 0, 1, 1], [], []>} : vector<128x4xbf16>, vector<4x4xbf16>, vector<128x4xf32> -> vector<128x4xf32>
    %c3 = arith.constant 3 : index
    %c0_24 = arith.constant 0 : index
    %c0_25 = arith.constant 0 : index
    %45 = vector.load %arg5[%c3, %c0_24, %c0_25] : memref<9x4x4xbf16, #tpu.memory_space<vmem>>, vector<1x4x4xbf16>
    %46 = vector.shape_cast %45 : vector<1x4x4xbf16> to vector<4x4xbf16>
    %cst_26 = arith.constant dense<0.000000e+00> : vector<128x4xf32>
    %47 = tpu.matmul %39, %46, %cst_26 {dimension_numbers = #tpu.dot_dimension_numbers<[1], [0], [0], [1], [0, 0, 1, 1], [], []>} : vector<128x4xbf16>, vector<4x4xbf16>, vector<128x4xf32> -> vector<128x4xf32>
    %48 = arith.addf %44, %47 : vector<128x4xf32>
    %c6 = arith.constant 6 : index
    %c0_27 = arith.constant 0 : index
    %c0_28 = arith.constant 0 : index
    %49 = vector.load %arg5[%c6, %c0_27, %c0_28] : memref<9x4x4xbf16, #tpu.memory_space<vmem>>, vector<1x4x4xbf16>
    %50 = vector.shape_cast %49 : vector<1x4x4xbf16> to vector<4x4xbf16>
    %cst_29 = arith.constant dense<0.000000e+00> : vector<128x4xf32>
    %51 = tpu.matmul %41, %50, %cst_29 {dimension_numbers = #tpu.dot_dimension_numbers<[1], [0], [0], [1], [0, 0, 1, 1], [], []>} : vector<128x4xbf16>, vector<4x4xbf16>, vector<128x4xf32> -> vector<128x4xf32>
    %52 = arith.addf %48, %51 : vector<128x4xf32>
    %53 = vector.shape_cast %52 : vector<128x4xf32> to vector<8x16x4xf32>
    %c1 = arith.constant 1 : index
    %c0_30 = arith.constant 0 : index
    %c0_31 = arith.constant 0 : index
    %54 = vector.load %arg5[%c1, %c0_30, %c0_31] : memref<9x4x4xbf16, #tpu.memory_space<vmem>>, vector<1x4x4xbf16>
    %55 = vector.shape_cast %54 : vector<1x4x4xbf16> to vector<4x4xbf16>
    %cst_32 = arith.constant dense<0.000000e+00> : vector<128x4xf32>
    %56 = tpu.matmul %37, %55, %cst_32 {dimension_numbers = #tpu.dot_dimension_numbers<[1], [0], [0], [1], [0, 0, 1, 1], [], []>} : vector<128x4xbf16>, vector<4x4xbf16>, vector<128x4xf32> -> vector<128x4xf32>
    %c4 = arith.constant 4 : index
    %c0_33 = arith.constant 0 : index
    %c0_34 = arith.constant 0 : index
    %57 = vector.load %arg5[%c4, %c0_33, %c0_34] : memref<9x4x4xbf16, #tpu.memory_space<vmem>>, vector<1x4x4xbf16>
    %58 = vector.shape_cast %57 : vector<1x4x4xbf16> to vector<4x4xbf16>
    %cst_35 = arith.constant dense<0.000000e+00> : vector<128x4xf32>
    %59 = tpu.matmul %39, %58, %cst_35 {dimension_numbers = #tpu.dot_dimension_numbers<[1], [0], [0], [1], [0, 0, 1, 1], [], []>} : vector<128x4xbf16>, vector<4x4xbf16>, vector<128x4xf32> -> vector<128x4xf32>
    %60 = arith.addf %56, %59 : vector<128x4xf32>
    %c7 = arith.constant 7 : index
    %c0_36 = arith.constant 0 : index
    %c0_37 = arith.constant 0 : index
    %61 = vector.load %arg5[%c7, %c0_36, %c0_37] : memref<9x4x4xbf16, #tpu.memory_space<vmem>>, vector<1x4x4xbf16>
    %62 = vector.shape_cast %61 : vector<1x4x4xbf16> to vector<4x4xbf16>
    %cst_38 = arith.constant dense<0.000000e+00> : vector<128x4xf32>
    %63 = tpu.matmul %41, %62, %cst_38 {dimension_numbers = #tpu.dot_dimension_numbers<[1], [0], [0], [1], [0, 0, 1, 1], [], []>} : vector<128x4xbf16>, vector<4x4xbf16>, vector<128x4xf32> -> vector<128x4xf32>
    %64 = arith.addf %60, %63 : vector<128x4xf32>
    %65 = vector.shape_cast %64 : vector<128x4xf32> to vector<8x16x4xf32>
    %c2 = arith.constant 2 : index
    %c0_39 = arith.constant 0 : index
    %c0_40 = arith.constant 0 : index
    %66 = vector.load %arg5[%c2, %c0_39, %c0_40] : memref<9x4x4xbf16, #tpu.memory_space<vmem>>, vector<1x4x4xbf16>
    %67 = vector.shape_cast %66 : vector<1x4x4xbf16> to vector<4x4xbf16>
    %cst_41 = arith.constant dense<0.000000e+00> : vector<128x4xf32>
    %68 = tpu.matmul %37, %67, %cst_41 {dimension_numbers = #tpu.dot_dimension_numbers<[1], [0], [0], [1], [0, 0, 1, 1], [], []>} : vector<128x4xbf16>, vector<4x4xbf16>, vector<128x4xf32> -> vector<128x4xf32>
    %c5 = arith.constant 5 : index
    %c0_42 = arith.constant 0 : index
    %c0_43 = arith.constant 0 : index
    %69 = vector.load %arg5[%c5, %c0_42, %c0_43] : memref<9x4x4xbf16, #tpu.memory_space<vmem>>, vector<1x4x4xbf16>
    %70 = vector.shape_cast %69 : vector<1x4x4xbf16> to vector<4x4xbf16>
    %cst_44 = arith.constant dense<0.000000e+00> : vector<128x4xf32>
    %71 = tpu.matmul %39, %70, %cst_44 {dimension_numbers = #tpu.dot_dimension_numbers<[1], [0], [0], [1], [0, 0, 1, 1], [], []>} : vector<128x4xbf16>, vector<4x4xbf16>, vector<128x4xf32> -> vector<128x4xf32>
    %72 = arith.addf %68, %71 : vector<128x4xf32>
    %c8 = arith.constant 8 : index
    %c0_45 = arith.constant 0 : index
    %c0_46 = arith.constant 0 : index
    %73 = vector.load %arg5[%c8, %c0_45, %c0_46] : memref<9x4x4xbf16, #tpu.memory_space<vmem>>, vector<1x4x4xbf16>
    %74 = vector.shape_cast %73 : vector<1x4x4xbf16> to vector<4x4xbf16>
    %cst_47 = arith.constant dense<0.000000e+00> : vector<128x4xf32>
    %75 = tpu.matmul %41, %74, %cst_47 {dimension_numbers = #tpu.dot_dimension_numbers<[1], [0], [0], [1], [0, 0, 1, 1], [], []>} : vector<128x4xbf16>, vector<4x4xbf16>, vector<128x4xf32> -> vector<128x4xf32>
    %76 = arith.addf %72, %75 : vector<128x4xf32>
    %77 = vector.shape_cast %76 : vector<128x4xf32> to vector<8x16x4xf32>
    %cst_48 = arith.constant 0.000000e+00 : f32
    %78 = vector.broadcast %cst_48 : f32 to vector<8x1x4xf32>
    %79 = vector.extract_strided_slice %53 {offsets = [0, 0, 0], sizes = [8, 15, 4], strides = [1, 1, 1]} : vector<8x16x4xf32> to vector<8x15x4xf32>
    %80 = tpu.concatenate %78, %79 in 1 : vector<8x1x4xf32>, vector<8x15x4xf32> -> vector<8x16x4xf32>
    %81 = arith.addf %65, %80 : vector<8x16x4xf32>
    %82 = vector.extract_strided_slice %77 {offsets = [0, 1, 0], sizes = [8, 15, 4], strides = [1, 1, 1]} : vector<8x16x4xf32> to vector<8x15x4xf32>
    %83 = tpu.concatenate %82, %78 in 1 : vector<8x15x4xf32>, vector<8x1x4xf32> -> vector<8x16x4xf32>
    %84 = arith.addf %81, %83 : vector<8x16x4xf32>
    %85 = vector.shape_cast %84 : vector<8x16x4xf32> to vector<128x4xf32>
    %c0_49 = arith.constant 0 : index
    %c0_50 = arith.constant 0 : index
    %86 = vector.load %arg6[%c0_49, %c0_50] : memref<1x4xf32, #tpu.memory_space<vmem>>, vector<1x4xf32>
    %87 = vector.broadcast %86 : vector<1x4xf32> to vector<128x4xf32>
    %88 = arith.addf %85, %87 : vector<128x4xf32>
    %cst_51 = arith.constant 0.000000e+00 : f32
    %89 = vector.broadcast %cst_51 : f32 to vector<128x4xf32>
    %90 = arith.maximumf %88, %89 : vector<128x4xf32>
    %91 = arith.truncf %90 : vector<128x4xf32> to vector<128x4xbf16>
    %c0_52 = arith.constant 0 : index
    %c0_53 = arith.constant 0 : index
    %92 = vector.load %arg7[%c0_52, %c0_53] : memref<4x16xbf16, #tpu.memory_space<vmem>>, vector<4x16xbf16>
    %cst_54 = arith.constant dense<0.000000e+00> : vector<128x16xf32>
    %93 = tpu.matmul %91, %92, %cst_54 {dimension_numbers = #tpu.dot_dimension_numbers<[1], [0], [0], [1], [0, 0, 1, 1], [], []>} : vector<128x4xbf16>, vector<4x16xbf16>, vector<128x16xf32> -> vector<128x16xf32>
    %c0_55 = arith.constant 0 : index
    %c0_56 = arith.constant 0 : index
    %94 = vector.load %arg8[%c0_55, %c0_56] : memref<1x16xf32, #tpu.memory_space<vmem>>, vector<1x16xf32>
    %95 = vector.broadcast %94 : vector<1x16xf32> to vector<128x16xf32>
    %96 = arith.addf %93, %95 : vector<128x16xf32>
    %c0_57 = arith.constant 0 : index
    %97 = arith.index_cast %1 : i32 to index
    %c0_58 = arith.constant 0 : index
    %c0_59 = arith.constant 0 : index
    %98 = vector.load %arg2[%c0_57, %97, %c0_58, %c0_59] : memref<1x16x16x16xbf16, #tpu.memory_space<vmem>>, vector<1x8x16x16xbf16>
    %99 = vector.shape_cast %98 : vector<1x8x16x16xbf16> to vector<8x16x16xbf16>
    %100 = vector.shape_cast %99 : vector<8x16x16xbf16> to vector<128x16xbf16>
    %101 = arith.extf %100 : vector<128x16xbf16> to vector<128x16xf32>
    %102 = arith.addf %96, %101 : vector<128x16xf32>
    %cst_60 = arith.constant 0.000000e+00 : f32
    %103 = vector.broadcast %cst_60 : f32 to vector<128x16xf32>
    %104 = arith.maximumf %102, %103 : vector<128x16xf32>
    %105 = vector.shape_cast %104 : vector<128x16xf32> to vector<8x16x16xf32>
    %106 = arith.truncf %105 : vector<8x16x16xf32> to vector<8x16x16xbf16>
    %c0_61 = arith.constant 0 : index
    %c0_62 = arith.constant 0 : index
    %c0_63 = arith.constant 0 : index
    %c0_64 = arith.constant 0 : index
    %107 = vector.load %arg9[%c0_61, %c0_62, %c0_63, %c0_64] : memref<1x8x16x16xbf16, #tpu.memory_space<vmem>>, vector<1x8x16x16xbf16>
    %108 = vector.shape_cast %107 : vector<1x8x16x16xbf16> to vector<8x16x16xbf16>
    %109 = vector.shape_cast %106 : vector<8x16x16xbf16> to vector<1x8x16x16xbf16>
    tpu.vector_store %arg9[%c0_61, %c0_62, %c0_63, %c0_64], %109 {strides = array<i32>} : memref<1x8x16x16xbf16, #tpu.memory_space<vmem>>, vector<1x8x16x16xbf16>,
    return
  }
  func.func @transform_0(%arg0: i32, %arg1: i32) -> (i32, i32, i32, i32) {
    %c0_i32 = arith.constant 0 : i32
    %c0_i32_0 = arith.constant 0 : i32
    %c0_i32_1 = arith.constant 0 : i32
    %c0_i32_2 = arith.constant 0 : i32
    return %arg0, %c0_i32, %c0_i32_0, %c0_i32_1 : i32, i32, i32, i32
  }
  func.func @transform_1(%arg0: i32, %arg1: i32) -> (i32, i32) {
    %c0_i32 = arith.constant 0 : i32
    %c0_i32_0 = arith.constant 0 : i32
    %c0_i32_1 = arith.constant 0 : i32
    return %c0_i32, %c0_i32_0 : i32, i32
  }
  func.func @transform_2(%arg0: i32, %arg1: i32) -> (i32, i32) {
    %c0_i32 = arith.constant 0 : i32
    %c0_i32_0 = arith.constant 0 : i32
    %c0_i32_1 = arith.constant 0 : i32
    return %c0_i32, %c0_i32_0 : i32, i32
  }
  func.func @transform_3(%arg0: i32, %arg1: i32) -> (i32, i32, i32) {
    %c0_i32 = arith.constant 0 : i32
    %c0_i32_0 = arith.constant 0 : i32
    %c0_i32_1 = arith.constant 0 : i32
    %c0_i32_2 = arith.constant 0 : i32
    return %c0_i32, %c0_i32_0, %c0_i32_1 : i32, i32, i32
  }
  func.func @transform_4(%arg0: i32, %arg1: i32) -> (i32, i32) {
    %c0_i32 = arith.constant 0 : i32
    %c0_i32_0 = arith.constant 0 : i32
    %c0_i32_1 = arith.constant 0 : i32
    return %c0_i32, %c0_i32_0 : i32, i32
  }
  func.func @transform_5(%arg0: i32, %arg1: i32) -> (i32, i32) {
    %c0_i32 = arith.constant 0 : i32
    %c0_i32_0 = arith.constant 0 : i32
    %c0_i32_1 = arith.constant 0 : i32
    return %c0_i32, %c0_i32_0 : i32, i32
  }
  func.func @transform_6(%arg0: i32, %arg1: i32) -> (i32, i32) {
    %c0_i32 = arith.constant 0 : i32
    %c0_i32_0 = arith.constant 0 : i32
    %c0_i32_1 = arith.constant 0 : i32
    return %c0_i32, %c0_i32_0 : i32, i32
  }
  func.func @transform_7(%arg0: i32, %arg1: i32) -> (i32, i32, i32, i32) {
    %c0_i32 = arith.constant 0 : i32
    %c0_i32_0 = arith.constant 0 : i32
    %c0_i32_1 = arith.constant 0 : i32
    return %arg0, %arg1, %c0_i32, %c0_i32_0 : i32, i32, i32, i32
  }
}

</mosaic_0001>

<bundles_post_ra>
// kernel: tpu_custom_call.1
= control target key start
LH: loop header
LB: loop body
LE: loop exit
PB: predicated region body
PF: predicated region fallthrough
CT: control target
= control target key end

     0   :  { %s2874_s0 = inlined_call_operand.hbm [shape: bf16[2,16,16,16], index: 0, kind: input, shape index: {}]   ;;  %s2875_s1 = inlined_call_operand.vmem [shape: bf16[16,4], index: 1, kind: input, shape index: {}]   ;;  %s2876_s2 = inlined_call_operand.vmem [shape: f32[1,4], index: 2, kind: input, shape index: {}]   ;;  %s2877_s3 = inlined_call_operand.vmem [shape: bf16[9,4,4], index: 3, kind: input, shape index: {}]   ;;  %s2878_s4 = inlined_call_operand.vmem [shape: f32[1,4], index: 4, kind: input, shape index: {}]   ;;  %s2879_s5 = inlined_call_operand.vmem [shape: bf16[4,16], index: 5, kind: input, shape index: {}]   ;;  %s2880_s6 = inlined_call_operand.vmem [shape: f32[1,16], index: 6, kind: input, shape index: {}]   ;;  %s2881_s7 = inlined_call_operand.hbm [shape: bf16[2,16,16,16], index: 7, kind: output, shape index: {}]  }
   0x1   :  { %2890 = sst [smem:[#allocation15_spill]] %s2881_s7 }
   0x2   :  { %12 = vsyncpa [#allocation3], 0 }
   0x3   :  { %14 = vsyncpa [#allocation3 + $0x1], 0 }
   0x4   :  { %15 = vsyncpa [#allocation4], 0 }
   0x5   :  { %17 = vsyncpa [#allocation4 + $0x1], 0  ;;  %s2178_s24 = smov 0   ;;  %s2180_s25 = smov 0  }
   0x6   :  { %s2182_s26 = smov 0   ;;  %s2184_s27 = smov 0  }
   0x7   :  { %s2186_s28 = smov 0   ;;  %s2188_s29 = smov 0  }
   0x8   :  { %s2190_s30 = smov 0   ;;  %s2192_s8 = smov 0  }
   0x9   :  { %s2194_s9 = smov 0   ;;  %s2196_s10 = smov 0  }
   0xa   :  { %s2198_s11 = smov 0  }
   0xb LB: > { %2891 = sst [smem:[#allocation8_spill]] %s2124_s9  ;;  %s1686_s12 = sadd.s32 4294967295, %s2132_s11   ;;  %s2132_s11 = sphi %s2198_s11, %s23_s11   ;;  %s2128_s10 = sphi %s2196_s10, %s2910_s10   ;;  %s2124_s9 = sphi %s2194_s9, %s2909_s9   ;;  %s2120_s8 = sphi %s2192_s8, %s2918_s8   ;;  %s2116_s30 = sphi %s2190_s30, %s2917_s30   ;;  %s2112_s29 = sphi %s2188_s29, %s2916_s29   ;;  %s2108_s28 = sphi %s2186_s28, %s2915_s28   ;;  %s2104_s27 = sphi %s2184_s27, %s2914_s27   ;;  %s2100_s26 = sphi %s2182_s26, %s2913_s26   ;;  %s2096_s25 = sphi %s2180_s25, %s2912_s25   ;;  %s2092_s24 = sphi %s2178_s24, %s2911_s24  }
   0xc   : > { %2892 = sst [smem:[#allocation9_spill]] %s2128_s10  ;;  %s1687_s13 = sadd.s32 4294967294, %s2132_s11  }
   0xd   : > { %s32_s14 = sadd.s32 1, %s2124_s9  ;;  %s35_s15 = sadd.s32 1, %s2128_s10 }
   0xe   : > { %p33_p0 = scmp.ge.s32.totalorder %s32_s14, 2  ;;  %s42_s16 = sadd.s32 1, %s2112_s29 }
   0xf   : > { %p49_p1 = scmp.ne.s32.totalorder %s2112_s29, %s2108_s28  ;;  %p50_p2 = scmp.eq.s32.totalorder %s2132_s11, 0 }
  0x10   : > { %s2920_s14 = smov (%p33_p0, %s32_s14), 0  ;;  %s2922_s15 = smov (!%p33_p0, %s35_s15), %s2128_s10 }
  0x11   : > { %2893 = sst [smem:[#allocation10_spill]] %s2920_s14  ;;  %p2242_p3 = por %p50_p2, %p49_p1 }
  0x12   : > { %p55_p4 = scmp.ne.s32.totalorder %s2108_s28, %s2104_s27  ;;  %p37_p5 = scmp.ge.s32.totalorder %s2922_s15, 2 }
  0x13   : > { %p56_p6 = scmp.eq.s32.totalorder %s1686_s12, 0  ;;  %s192_s18 = ssub.s32 %s2124_s9, %s2920_s14 }
  0x14   : > { %s196_s19 = sadd.s32 1, %s2100_s26  ;;  %s2924_s15 = smov (%p37_p5, %s2922_s15), 0 }
  0x15   : > { %2895 = sst [smem:[#allocation11_spill]] %s2924_s15  ;;  %p2252_p7 = por %p56_p6, %p55_p4 }
  0x16   : > { %p206_p8 = scmp.ne.s32.totalorder %s2100_s26, %s2096_s25  ;;  %s39_s21 = ssub.s32 %s2128_s10, %s2924_s15 }
  0x17   : > { %p207_p9 = scmp.eq.s32.totalorder %s1686_s12, 3  ;;  %p40_p10 = scmp.eq.s32.totalorder %s39_s21, 0 }
  0x18   : > { %s193_s22 = sor.u32 %s192_s18, %s39_s21  ;;  %p212_p13 = scmp.ne.s32.totalorder %s2096_s25, %s2092_s24 }
  0x19   : > { %p194_p11 = scmp.eq.s32.totalorder %s193_s22, 0  ;;  %p2260_p12 = por %p207_p9, %p206_p8 }
  0x1a   : > { %s2265_s27 = scalar_select %p40_p10, %s2112_s29, %s42_s16  }
  0x1b   : > { %s2897_s23 = scalar_select %p2260_p12, 1, 0 }
  0x1c   : > { %2899 = sst [smem:[#allocation13_spill]] %s2265_s27  ;;  %p213_p0 = scmp.eq.s32.totalorder %s1687_s13, 3 }
  0x1d   : > { %2898 = sst [smem:[#allocation12_spill]] %s2897_s23  ;;  %p1883_p1 = scmp.lt.s32.totalorder %s2132_s11, 4 }
  0x1e   : > { %s2268_s14 = scalar_select %p194_p11, %s2100_s26, %s196_s19  }
  0x1f   : > { %p2273_p2 = por %p213_p0, %p212_p13  ;;  %s251_s12 = sand.u32 1, %s2112_s29  }
  0x20   : > { %2900 = sst [smem:[#allocation14_spill]] %s2268_s14  ;;  %s1690_s18 = sshll.u32 %s251_s12, 7 }
  0x21   : > { %s1845_s21 = sshll.u32 %s2128_s10, 7  ;;  %s255_s16 = scalar_lea.vmem [#allocation2], %s1690_s18 }
  0x22   : > { %s260_s23 = scalar_lea.hbm %s2874_s0, %s1845_s21  ;;  %s263_s27 = sshll.u32 %s255_s16, 4  ;;  %s264_s27 = int_to_ptr.vmem [resolvable:$true] %s263_s27 }
  0x23   : > { %s261_s7 = sshll.u32 %s260_s23, 4  ;;  %p1876_p4 = pnand %p1883_p1, %p2242_p3  ;;  %s262_s7 = int_to_ptr.hbm [resolvable:$true] %s261_s7 }
  0x24   : > { %p1693_p5 = scmp.ge.s32.totalorder %s2132_s11, 1  ;;  %s252_s13 = scalar_lea.sflag [#allocation3], %s251_s12 }
  0x25   : > { %s2134_s19 = smov 64   ;;  %s2135_s14 = smov 4  }
  0x26   : > { %1878 = dma.hbm_to_vmem [thread:$0]  (!%p1876_p4), %s262_s7, 2048, %s264_s27, %s252_s13, %s2134_s19, %s2134_s19, %s2135_s14  }
  0x27   : > { %p271_p6 = scmp.lt.s32.totalorder %s2132_s11, 5 }
  0x29   : > { %p272_p8 = pnand %p1693_p5, %p271_p6 }
  0x2a   : > { %s277_s10 = sand.u32 (!%p272_p8), 1, %s2108_s28  }
  0x2b   : > { %275 = sbr.rel (%p272_p8) target bundleno = 905 (0x389), region = 48  ;;  %s1694_s15 = sshll.u32 (!%p272_p8), %s277_s10, 7 }
  0x2c   : > { %s278_s21 = scalar_lea.sflag (!%p272_p8), [#allocation3], %s277_s10  ;;  %s2287_s18 = scalar_lea.vmem (!%p272_p8), [#allocation2], %s1694_s15 }
  0x30   : > { %2083 = dma.done.wait (%p2252_p7), %s278_s21, 2048  }
  0x31   : > { %2085 = vsyncadd (%p2252_p7), %s278_s21, 4294965248  ;;  %s2889_s7 = sshll.u32 %s2116_s30, 3  ;;  %p327_p3 = scmp.ne.s32.totalorder %s2116_s30, 0  ;;  %v1858_v0 = vld [vmem:[%s2875_s1] sm:$0xff]  ;;  %vm461_vm0 = vcmask 130048   ;;  %vm659_vm1 = vcmask 1041408  }
  0x32   : > { %s1697_s14 = sadd.s32 4294967295, %s2889_s7  ;;  %499 = vmatpush.bf16.msra.mxu0 %v1858_v0  ;;  %p356_p10 = scmp.ne.s32.totalorder %s2116_s30, 1  ;;  %v1750_v23 = vld [vmem:[%s2877_s3 + $0x6] sm:$0x3]  ;;  %v591_v24 = vld [vmem:[%s2877_s3] sm:$0x3] }
  0x33   : > { %p317_p9 = scmp.gt.s32.totalorder %s1697_s14, 0  ;;  %v661_v28 = vsel %vm659_vm1, %v1750_v23, 0  ;;  %v721_v29 = vsel %vm659_vm1, %v591_v24, 0  ;;  %v2337_v40 = vld [vmem:[%s2876_s2] ss:$0 sm:$0xff]  ;;  %vm634_vm2 = vcmask 31744  }
  0x34   : > { %s328_s17 = scalar_select %p327_p3, 1, 0  ;;  %1869 = vmatpush.bf16.msra.mxu2 %v721_v29  ;;  %1868 = vmatpush.bf16.msra.mxu1 %v661_v28  ;;  %v1776_v41 = vld [vmem:[%s2877_s3 + $0x2] sm:$0x3]  ;;  %v1777_v45 = vld [vmem:[%s2877_s3 + $0x8] sm:$0x3] }
  0x35   : > { %s2926_s14 = smov (!%p317_p9, %s1697_s14), 0  ;;  %v907_v42 = vsel %vm659_vm1, %v1776_v41, 0  ;;  %v855_v47 = vsel %vm659_vm1, %v1777_v45, 0  ;;  %v1767_v54 = vld [vmem:[%s2877_s3 + $0xc] sm:$0x3]  ;;  %vm1222_vm3 = vcmask 1040384  }
  0x36   : > { %s329_s23 = scvt.s32.f32 %s328_s17  ;;  %s1846_s12 = sshll.u32 %s2926_s14, 3  ;;  %670 = vmatpush.bf16.msrb.mxu0 %v661_v28  ;;  %v783_v56 = vsel %vm659_vm1, %v1767_v54, 0  ;;  %vm1303_vm4 = vcmask 1046528   ;;  %vm1557_vm5 = vcmask 125952  }
  0x37   : > { %s324_s13 = scalar_lea.vmem %s2287_s18, %s1846_s12 [#allocation2]  ;;  %s1849_s14 = sshll.u32 %s2116_s30, 6  ;;  %1870 = vmatpush.bf16.msra.mxu3 %v783_v56 }
  0x38   : > { %s332_s22 = sshrl.u32 %s329_s23, 16  ;;  %p331_p7 = scmp.ne.f32.partialorder %s329_s23, %s329_s23  ;;  %v1861_v1 = vld [vmem:[%s324_s13] sm:$0xff]   ;;  %916 = vmatpush.bf16.msrb.mxu2 %v907_v42  ;;  %864 = vmatpush.bf16.msrb.mxu1 %v855_v47 }
  0x39   : > { %s333_s20 = sand.u32 1, %s332_s22  ;;  %v1862_v2 = vunpack.c.l.bf16 %v1861_v1  ;;  %v1863_v3 = vunpack.c.h.bf16 %v1861_v1 }
  0x3a   : > { %s334_s16 = sadd.s32 32767, %s333_s20 }
  0x3b   : > { %s335_s19 = sadd.s32 %s334_s16, %s329_s23  ;;  %s2304_s23 = scalar_lea.vmem %s2287_s18, %s1849_s14 [#allocation2] }
  0x3c   : > { %s336_s15 = sand.u32 4294901760, %s335_s19  ;;  %v1850_v13 = vld [vmem:[%s2304_s23] sm:$0xff]  ;;  %v1851_v14 = vld [vmem:[%s2304_s23 + $0x8] sm:$0xff]  ;;  %v1852_v15 = vld [vmem:[%s2304_s23 + $0x10] sm:$0xff]  ;;  %s2902_s16 = sshll.u32 %s2116_s30, 3 }
  0x3d   : > { %s2928_s15 = smov (%p331_p7, %s336_s15), 2143289344  ;;  %v1853_v16 = vld [vmem:[%s2304_s23 + $0x18] sm:$0xff]  ;;  %v1854_v17 = vld [vmem:[%s2304_s23 + $0x20] sm:$0xff]  ;;  %v1855_v18 = vld [vmem:[%s2304_s23 + $0x28] sm:$0xff]  ;;  %s319_s13 = sadd.s32 8, %s2902_s16 }
  0x3e   : > { %s339_s21 = sshrl.u32 %s2928_s15, 16  ;;  %p320_p13 = scmp.lt.s32.totalorder %s319_s13, 15  ;;  %v1856_v19 = vld [vmem:[%s2304_s23 + $0x30] sm:$0xff]  ;;  %v1857_v25 = vld [vmem:[%s2304_s23 + $0x38] sm:$0xff] }
  0x3f   : > { %s340_s7 = sshll.u32 %s339_s21, 16  ;;  %s2903_s16 = sld [smem:[#allocation15_spill]] }
  0x40   : > { %s341_s17 = sor.u32 %s340_s7, %s339_s21  ;;  %s2932_s13 = smov (!%p320_p13, %s319_s13), 15 }
  0x41   : > { %v342_v4 = vstv %s341_s17  ;;  %s357_s7 = scalar_select %p356_p10, 1, 0 }
  0x42   : > { %v346_v5 = vunpack.c.l.bf16 %v342_v4  ;;  %s1847_s21 = sshll.u32 %s2932_s13, 3 }
  0x43   : > { %s358_s10 = scvt.s32.f32 %s357_s7  ;;  %s353_s14 = scalar_lea.vmem %s2287_s18, %s1847_s21 [#allocation2] }
  0x44   : > { %v347_v6 = vmul.f32 %v1862_v2, %v346_v5  ;;  %v348_v7 = vmul.f32 %v1863_v3, %v346_v5  ;;  %v1865_v20 = vld [vmem:[%s353_s14] sm:$0xff]   ;;  %s310_s14 = sand.u32 1, %s2096_s25  }
  0x45   : > { %s361_s27 = sshrl.u32 %s358_s10, 16  ;;  %p360_p11 = scmp.ne.f32.partialorder %s358_s10, %s358_s10  ;;  %v1866_v22 = vunpack.c.l.bf16 %v1865_v20  ;;  %v1867_v26 = vunpack.c.h.bf16 %v1865_v20 }
  0x46   : > { %v349_v8 = vpack.c.bf16 %v347_v6, %v347_v6  ;;  %v350_v9 = vpack.c.bf16 %v348_v7, %v348_v7  ;;  %s362_s12 = sand.u32 1, %s361_s27 }
  0x47   : > { %s363_s22 = sadd.s32 32767, %s362_s12  ;;  %s1859_s12 = sshll.u32 %s2116_s30, 4 }
  0x48   : > { %v425_v10 = vunpack.c.l.b16 %v349_v8  ;;  %v426_v11 = vunpack.c.l.b16 %v350_v9  ;;  %s364_s20 = sadd.s32 %s363_s22, %s358_s10  ;;  %s1841_s10 = sshll.u32 %s2120_s8, 5 }
  0x49   : > { %s365_s19 = sand.u32 4294901760, %s364_s20  ;;  %s1587_s22 = sadd.s32 %s1859_s12, %s1841_s10 }
  0x4a   : > { %v445_v12 = vpack.c.b16 %v426_v11, %v425_v10  ;;  %s2930_s19 = smov (%p360_p11, %s365_s19), 2143289344  ;;  %v1804_v11 = vld [vmem:[%s2877_s3 + $0xa] sm:$0x3]  ;;  %s1842_s18 = sshll.u32 %s1587_s22, 2 }
  0x4b   : > { %s368_s15 = sshrl.u32 %s2930_s19, 16  ;;  %s1589_s30 = scalar_lea.hbm %s2903_s16, %s1842_s18 }
  0x4c   : > { %1740 = vmatmul.msk.bf16.vlgmr.msra.gmra.mxu0 %vm461_vm0, %v445_v12  ;;  %s369_s17 = sshll.u32 %s368_s15, 16  ;;  %s1592_s19 = sshll.u32 %s1589_s30, 4  ;;  %s1593_s19 = int_to_ptr.hbm [resolvable:$true] %s1592_s19 }
  0x4d   : > { %s370_s7 = sor.u32 %s369_s17, %s368_s15  ;;  %730 = vmatpush.bf16.msra.mxu0 %v721_v29  ;;  %s1575_s15 = scalar_lea.sflag [#allocation4], %s310_s14 }
  0x4e   : > { %v371_v21 = vstv %s370_s7  ;;  %s1695_s7 = sshll.u32 %s310_s14, 6  ;;  %s2024_s21 = sshra.s32 %s1593_s19, 4  ;;  %s2025_s21 = int_to_ptr.hbm [resolvable:$true] %s2024_s21 }
  0x4f   : > { %v375_v27 = vunpack.c.l.bf16 %v371_v21  ;;  %s2763_s27 = scalar_lea.vmem [#allocation5], %s1695_s7  ;;  %s2026_s17 = scalar_lea.hbm %s2025_s21, 64 }
  0x50   : > { %s1590_s13 = sshll.u32 %s2763_s27, 4  ;;  %p2027_p0 = scmp.ne.s32.totalorder %s2025_s21, %s2026_s17  ;;  %s1591_s13 = int_to_ptr.vmem [resolvable:$true] %s1590_s13 }
  0x51   : > { %v376_v31 = vmul.f32 %v1866_v22, %v375_v27  ;;  %v377_v32 = vmul.f32 %v1867_v26, %v375_v27  ;;  %s2030_s10 = scalar_lea.hbm %s2903_s16, 256  ;;  %p2031_p5 = scmp.lt.s32.totalorder %s2025_s21, %s2903_s16 }
  0x52   : > { %p2028_p1 = pnand %p2027_p0, %p2260_p12  ;;  %p2032_p6 = scmp.lt.s32.totalorder %s2030_s10, %s2026_s17 }
  0x53   : > { %v378_v33 = vpack.c.bf16 %v376_v31, %v376_v31  ;;  %v379_v34 = vpack.c.bf16 %v377_v32, %v377_v32 }
  0x54   : > { %p2029_p4 = pneg %p2028_p1  ;;  %p2033_p8 = por %p2032_p6, %p2031_p5 }
  0x55   : > { %v443_v36 = vunpack.c.l.b16 %v378_v33  ;;  %v444_v37 = vunpack.c.l.b16 %v379_v34 }
  0x56   : > { %p2034_p3 = pnand %p2033_p8, %p2029_p4 }
  0x57   : > { %v454_v38 = vpack.c.b16 %v444_v37, %v443_v36 }
  0x5c   : > { %1741 = vmatmul.msk.bf16.gmra.mxu0 %vm461_vm0, %v1850_v13 }
  0x6c   : > { %1742 = vmatmul.msk.bf16.gmra.mxu0 %vm461_vm0, %v1851_v14 }
  0x7c   : > { %1743 = vmatmul.msk.bf16.gmra.mxu0 %vm461_vm0, %v1852_v15  ;;  %v1033_v15 = vsel %vm659_vm1, %v1804_v11, 0 }
  0x8c   : > { %1744 = vmatmul.msk.bf16.gmra.mxu0 %vm461_vm0, %v1853_v16 }
  0x9c   : > { %1745 = vmatmul.msk.bf16.gmra.mxu0 %vm461_vm0, %v1854_v17 }
  0xac   : > { %1746 = vmatmul.msk.bf16.gmra.mxu0 %vm461_vm0, %v1855_v18 }
  0xbc   : > { %1747 = vmatmul.msk.bf16.gmra.mxu0 %vm461_vm0, %v1856_v19 }
  0xc9   : > { %v501_v30 = vpop.f32.mrf.mxu0 }
  0xca   : > { %v502_v59 = vadd.f32 %v2337_v40, %v501_v30 }
  0xcc   : > { %1748 = vmatmul.msk.bf16.gmra.mxu0 %vm461_vm0, %v1857_v25  ;;  %v551_v62 = vmax.f32 %v502_v59, 0.0 }
  0xce   : > { %v571_v3 = vpack.c.bf16 %v551_v62, %v551_v62 }
  0xd0   : > { %v714_v8 = vunpack.c.l.b16 %v571_v3 }
  0xd1   : > { %v503_v35 = vpop.f32.mrf.mxu0 }
  0xd2   : > { %v504_v57 = vadd.f32 %v2337_v40, %v503_v35 }
  0xd4   : > { %v552_v61 = vmax.f32 %v504_v57, 0.0 }
  0xd6   : > { %v572_v1 = vpack.c.bf16 %v552_v61, %v552_v61 }
  0xd8   : > { %v715_v6 = vunpack.c.l.b16 %v572_v1 }
  0xd9   : > { %v506_v39 = vpop.f32.mrf.mxu0 }
  0xda   : > { %v507_v43 = vadd.f32 %v2337_v40, %v506_v39  ;;  %v2367_v13 = vpack.c.b16 %v715_v6, %v714_v8 }
  0xdc   : > { %1749 = vmatmul.msk.bf16.gmra.mxu0 %vm461_vm0, %v454_v38  ;;  %v553_v44 = vmax.f32 %v507_v43, 0.0 }
  0xde   : > { %v573_v49 = vpack.c.bf16 %v553_v44, %v553_v44 }
  0xe0   : > { %v610_v52 = vunpack.c.l.b16 %v573_v49 }
  0xe1   : > { %v508_v46 = vpop.f32.mrf.mxu0 }
  0xe2   : > { %v509_v48 = vadd.f32 %v2337_v40, %v508_v46 }
  0xe4   : > { %v554_v50 = vmax.f32 %v509_v48, 0.0 }
  0xe6   : > { %v574_v51 = vpack.c.bf16 %v554_v50, %v554_v50 }
  0xe8   : > { %v611_v53 = vunpack.c.l.b16 %v574_v51 }
  0xe9   : > { %v511_v55 = vpop.f32.mrf.mxu0 }
  0xea   : > { %v2355_v58 = vpack.c.b16 %v611_v53, %v610_v52  ;;  %v512_v60 = vadd.f32 %v2337_v40, %v511_v55 }
  0xec   : > { %1751 = vmatmul.msk.bf16.vlgmr.msrb.gmra.mxu0 %vm634_vm2, %v2355_v58  ;;  %1760 = vmatmul.msk.bf16.vlgmr.msra.gmra.mxu2 %vm634_vm2, %v2355_v58  ;;  %v555_v63 = vmax.f32 %v512_v60, 0.0 }
  0xed   : > { %792 = vmatpush.bf16.msrb.mxu0 %v783_v56 }
  0xee   : > { %v575_v4 = vpack.c.bf16 %v555_v63, %v555_v63 }
  0xf0   : > { %v612_v9 = vunpack.c.l.b16 %v575_v4 }
  0xf1   : > { %v513_v0 = vpop.f32.mrf.mxu0 }
  0xf2   : > { %v514_v2 = vadd.f32 %v2337_v40, %v513_v0 }
  0xf4   : > { %v556_v5 = vmax.f32 %v514_v2, 0.0 }
  0xf6   : > { %v576_v7 = vpack.c.bf16 %v556_v5, %v556_v5 }
  0xf8   : > { %v613_v10 = vunpack.c.l.b16 %v576_v7  ;;  %v1821_v7 = vld [vmem:[%s2877_s3 + $0x10] sm:$0x3] }
  0xf9   : > { %v516_v12 = vpop.f32.mrf.mxu0 }
  0xfa   : > { %v2369_v14 = vpack.c.b16 %v613_v10, %v612_v9  ;;  %v517_v16 = vadd.f32 %v2337_v40, %v516_v12  ;;  %v1139_v9 = vsel %vm659_vm1, %v1821_v7, 0  ;;  %v1803_v12 = vld [vmem:[%s2877_s3 + $0x4] sm:$0x3] }
  0xfb   : > { %1148 = vmatpush.bf16.msra.mxu2 %v1139_v9 }
  0xfc   : > { %1752 = vmatmul.msk.bf16.vlgmr.msra.gmra.mxu1 %vm634_vm2, %v2369_v14  ;;  %1759 = vmatmul.msk.bf16.vlgmr.msra.gmra.mxu0 %vm634_vm2, %v2367_v13  ;;  %v557_v17 = vmax.f32 %v517_v16, 0.0 }
  0xfd   : > { %1761 = vmatmul.msk.bf16.gmra.mxu2 %vm634_vm2, %v2369_v14  ;;  %1042 = vmatpush.bf16.msra.mxu0 %v1033_v15  ;;  %v1085_v15 = vsel %vm659_vm1, %v1803_v12, 0 }
  0xfe   : > { %v577_v20 = vpack.c.bf16 %v557_v17, %v557_v17  ;;  %1094 = vmatpush.bf16.msra.mxu1 %v1085_v15 }
 0x100   : > { %v614_v23 = vunpack.c.l.b16 %v577_v20 }
 0x101   : > { %v518_v18 = vpop.f32.mrf.mxu0 }
 0x102   : > { %v519_v19 = vadd.f32 %v2337_v40, %v518_v18 }
 0x104   : > { %v558_v21 = vmax.f32 %v519_v19, 0.0 }
 0x106   : > { %v578_v22 = vpack.c.bf16 %v558_v21, %v558_v21 }
 0x108   : > { %v615_v24 = vunpack.c.l.b16 %v578_v22 }
 0x109   : > { %v521_v25 = vpop.f32.mrf.mxu0 }
 0x10a   : > { %v2380_v26 = vpack.c.b16 %v615_v24, %v614_v23  ;;  %v522_v27 = vadd.f32 %v2337_v40, %v521_v25  ;;  %v1794_v24 = vld [vmem:[%s2877_s3 + $0xe] sm:$0x3] }
 0x10c   : > { %1753 = vmatmul.msk.bf16.gmra.mxu1 %vm634_vm2, %v2380_v26  ;;  %1768 = vmatmul.msk.bf16.vlgmr.msrb.gmra.mxu0 %vm634_vm2, %v2369_v14  ;;  %v559_v28 = vmax.f32 %v522_v27, 0.0  ;;  %v961_v27 = vsel %vm659_vm1, %v1794_v24, 0 }
 0x10d   : > { %1762 = vmatmul.msk.bf16.gmra.mxu2 %vm634_vm2, %v2380_v26  ;;  %1769 = vmatmul.msk.bf16.vlgmr.msra.gmra.mxu3 %vm634_vm2, %v2380_v26 }
 0x10e   : > { %v579_v31 = vpack.c.bf16 %v559_v28, %v559_v28  ;;  %970 = vmatpush.bf16.msrb.mxu3 %v961_v27 }
 0x110   : > { %v616_v34 = vunpack.c.l.b16 %v579_v31 }
 0x111   : > { %v523_v29 = vpop.f32.mrf.mxu0 }
 0x112   : > { %v524_v30 = vadd.f32 %v2337_v40, %v523_v29 }
 0x114   : > { %v560_v32 = vmax.f32 %v524_v30, 0.0 }
 0x116   : > { %v580_v33 = vpack.c.bf16 %v560_v32, %v560_v32 }
 0x118   : > { %v617_v35 = vunpack.c.l.b16 %v580_v33 }
 0x119   : > { %v526_v36 = vpop.f32.mrf.mxu0 }
 0x11a   : > { %v2392_v37 = vpack.c.b16 %v617_v35, %v616_v34  ;;  %v527_v38 = vadd.f32 %v2337_v40, %v526_v36 }
 0x11c   : > { %1754 = vmatmul.msk.bf16.gmra.mxu1 %vm634_vm2, %v2392_v37  ;;  %1805 = vmatmul.msk.bf16.vlgmr.msra.gmra.mxu0 %vm634_vm2, %v2355_v58  ;;  %v561_v39 = vmax.f32 %v527_v38, 0.0 }
 0x11d   : > { %1763 = vmatmul.msk.bf16.gmra.mxu2 %vm634_vm2, %v2392_v37  ;;  %1770 = vmatmul.msk.bf16.gmra.mxu3 %vm634_vm2, %v2392_v37 }
 0x11e   : > { %v581_v43 = vpack.c.bf16 %v561_v39, %v561_v39 }
 0x120   : > { %v618_v46 = vunpack.c.l.b16 %v581_v43 }
 0x121   : > { %v528_v41 = vpop.f32.mrf.mxu0 }
 0x122   : > { %v529_v42 = vadd.f32 %v2337_v40, %v528_v41 }
 0x124   : > { %v562_v44 = vmax.f32 %v529_v42, 0.0 }
 0x126   : > { %v582_v45 = vpack.c.bf16 %v562_v44, %v562_v44 }
 0x128   : > { %v619_v47 = vunpack.c.l.b16 %v582_v45 }
 0x129   : > { %v531_v48 = vpop.f32.mrf.mxu0 }
 0x12a   : > { %v2404_v49 = vpack.c.b16 %v619_v47, %v618_v46  ;;  %v532_v50 = vadd.f32 %v2337_v40, %v531_v48 }
 0x12c   : > { %1755 = vmatmul.msk.bf16.gmra.mxu1 %vm634_vm2, %v2404_v49  ;;  %1806 = vmatmul.msk.bf16.gmra.mxu0 %vm634_vm2, %v2369_v14  ;;  %v563_v51 = vmax.f32 %v532_v50, 0.0 }
 0x12d   : > { %1764 = vmatmul.msk.bf16.gmra.mxu2 %vm634_vm2, %v2404_v49  ;;  %1771 = vmatmul.msk.bf16.gmra.mxu3 %vm634_vm2, %v2404_v49 }
 0x12e   : > { %v583_v54 = vpack.c.bf16 %v563_v51, %v563_v51 }
 0x130   : > { %v620_v57 = vunpack.c.l.b16 %v583_v54 }
 0x131   : > { %v533_v52 = vpop.f32.mrf.mxu0 }
 0x132   : > { %v534_v53 = vadd.f32 %v2337_v40, %v533_v52 }
 0x134   : > { %v564_v55 = vmax.f32 %v534_v53, 0.0 }
 0x136   : > { %v584_v56 = vpack.c.bf16 %v564_v55, %v564_v55 }
 0x138   : > { %v621_v59 = vunpack.c.l.b16 %v584_v56 }
 0x139   : > { %v536_v60 = vpop.f32.mrf.mxu0 }
 0x13a   : > { %v2416_v61 = vpack.c.b16 %v621_v59, %v620_v57  ;;  %v537_v62 = vadd.f32 %v2337_v40, %v536_v60 }
 0x13c   : > { %1756 = vmatmul.msk.bf16.gmra.mxu1 %vm634_vm2, %v2416_v61  ;;  %1807 = vmatmul.msk.bf16.gmra.mxu0 %vm634_vm2, %v2380_v26  ;;  %v565_v63 = vmax.f32 %v537_v62, 0.0 }
 0x13d   : > { %1765 = vmatmul.msk.bf16.gmra.mxu2 %vm634_vm2, %v2416_v61  ;;  %1772 = vmatmul.msk.bf16.gmra.mxu3 %vm634_vm2, %v2416_v61 }
 0x13e   : > { %v585_v2 = vpack.c.bf16 %v565_v63, %v565_v63 }
 0x140   : > { %v622_v5 = vunpack.c.l.b16 %v585_v2 }
 0x141   : > { %v538_v0 = vpop.f32.mrf.mxu0 }
 0x142   : > { %v539_v1 = vadd.f32 %v2337_v40, %v538_v0 }
 0x144   : > { %v566_v3 = vmax.f32 %v539_v1, 0.0 }
 0x146   : > { %v586_v4 = vpack.c.bf16 %v566_v3, %v566_v3 }
 0x148   : > { %v623_v6 = vunpack.c.l.b16 %v586_v4 }
 0x149   : > { %v541_v8 = vpop.f32.mrf.mxu0 }
 0x14a   : > { %v2432_v10 = vpack.c.b16 %v623_v6, %v622_v5  ;;  %v542_v11 = vadd.f32 %v2337_v40, %v541_v8 }
 0x14c   : > { %1757 = vmatmul.msk.bf16.gmra.mxu1 %vm634_vm2, %v2432_v10  ;;  %1808 = vmatmul.msk.bf16.gmra.mxu0 %vm634_vm2, %v2392_v37  ;;  %v567_v16 = vmax.f32 %v542_v11, 0.0 }
 0x14d   : > { %1766 = vmatmul.msk.bf16.gmra.mxu2 %vm634_vm2, %v2432_v10  ;;  %1773 = vmatmul.msk.bf16.gmra.mxu3 %vm634_vm2, %v2432_v10 }
 0x14e   : > { %v587_v19 = vpack.c.bf16 %v567_v16, %v567_v16 }
 0x150   : > { %v624_v22 = vunpack.c.l.b16 %v587_v19 }
 0x151   : > { %v543_v17 = vpop.f32.mrf.mxu0 }
 0x152   : > { %v544_v18 = vadd.f32 %v2337_v40, %v543_v17 }
 0x154   : > { %v568_v20 = vmax.f32 %v544_v18, 0.0 }
 0x156   : > { %v588_v21 = vpack.c.bf16 %v568_v20, %v568_v20 }
 0x158   : > { %v625_v23 = vunpack.c.l.b16 %v588_v21 }
 0x159   : > { %v546_v25 = vpop.f32.mrf.mxu0 }
 0x15a   : > { %v2452_v28 = vpack.c.b16 %v625_v23, %v624_v22  ;;  %v547_v29 = vadd.f32 %v2337_v40, %v546_v25 }
 0x15c   : > { %1758 = vmatmul.msk.bf16.gmra.mxu1 %vm634_vm2, %v2452_v28  ;;  %1809 = vmatmul.msk.bf16.gmra.mxu0 %vm634_vm2, %v2404_v49  ;;  %v569_v30 = vmax.f32 %v547_v29, 0.0 }
 0x15d   : > { %1774 = vmatmul.msk.bf16.gmra.mxu3 %vm634_vm2, %v2452_v28  ;;  %1786 = vmatmul.msk.bf16.vlgmr.msrb.gmra.mxu2 %vm634_vm2, %v2367_v13 }
 0x15e   : > { %v589_v32 = vpack.c.bf16 %v569_v30, %v569_v30 }
 0x160   : > { %v776_v35 = vunpack.c.l.b16 %v589_v32 }
 0x161   : > { %v548_v31 = vpop.f32.mrf.mxu0 }
 0x162   : > { %v549_v33 = vadd.f32 %v2337_v40, %v548_v31 }
 0x164   : > { %v570_v34 = vmax.f32 %v549_v33, 0.0 }
 0x166   : > { %v590_v36 = vpack.c.bf16 %v570_v34, %v570_v34 }
 0x168   : > { %v777_v38 = vunpack.c.l.b16 %v590_v36 }
 0x16a   : > { %v2464_v39 = vpack.c.b16 %v777_v38, %v776_v35 }
 0x16c   : > { %1778 = vmatmul.msk.bf16.vlgmr.msrb.gmra.mxu1 %vm634_vm2, %v2355_v58  ;;  %1810 = vmatmul.msk.bf16.gmra.mxu0 %vm634_vm2, %v2416_v61 }
 0x16d   : > { %1775 = vmatmul.msk.bf16.gmra.mxu3 %vm634_vm2, %v2464_v39  ;;  %1787 = vmatmul.msk.bf16.gmra.mxu2 %vm634_vm2, %v2355_v58 }
 0x16f   : > { %v737_v41 = vpop.f32.mrf.mxu2 }
 0x177   : > { %v739_v40 = vpop.f32.mrf.mxu2 }
 0x179   : > { %v677_v42 = vpop.f32.mrf.mxu1 }
 0x17a   : > { %v738_v43 = vadd.f32 %v737_v41, %v677_v42 }
 0x17c   : > { %1779 = vmatmul.msk.bf16.gmra.mxu1 %vm634_vm2, %v2369_v14  ;;  %1811 = vmatmul.msk.bf16.gmra.mxu0 %vm634_vm2, %v2432_v10 }
 0x17d   : > { %1788 = vmatmul.msk.bf16.gmra.mxu2 %vm634_vm2, %v2369_v14  ;;  %1795 = vmatmul.msk.bf16.vlgmr.msrb.gmra.mxu3 %vm634_vm2, %v2369_v14 }
 0x180   : > { %v742_v44 = vpop.f32.mrf.mxu2 }
 0x181   : > { %v679_v45 = vpop.f32.mrf.mxu1 }
 0x182   : > { %v740_v46 = vadd.f32 %v739_v40, %v679_v45 }
 0x188   : > { %v744_v47 = vpop.f32.mrf.mxu2 }
 0x189   : > { %v682_v48 = vpop.f32.mrf.mxu1 }
 0x18a   : > { %v743_v50 = vadd.f32 %v742_v44, %v682_v48 }
 0x18c   : > { %1780 = vmatmul.msk.bf16.gmra.mxu1 %vm634_vm2, %v2380_v26  ;;  %1812 = vmatmul.msk.bf16.gmra.mxu0 %vm634_vm2, %v2452_v28 }
 0x18d   : > { %1789 = vmatmul.msk.bf16.gmra.mxu2 %vm634_vm2, %v2380_v26  ;;  %1796 = vmatmul.msk.bf16.gmra.mxu3 %vm634_vm2, %v2380_v26 }
 0x190   : > { %v747_v51 = vpop.f32.mrf.mxu2  ;;  %v799_v52 = vpop.f32.mrf.mxu3 }
 0x191   : > { %v2490_v53 = vadd.f32 %v799_v52, %v738_v43  ;;  %v684_v54 = vpop.f32.mrf.mxu1 }
 0x192   : > { %v745_v55 = vadd.f32 %v744_v47, %v684_v54 }
 0x193   : > { %v1226_v63 = vrot.slane %v2490_v53, 7 }
 0x198   : > { %v749_v56 = vpop.f32.mrf.mxu2  ;;  %v801_v57 = vpop.f32.mrf.mxu3 }
 0x199   : > { %v837_v59 = vadd.f32 %v801_v57, %v740_v46  ;;  %v687_v60 = vpop.f32.mrf.mxu1 }
 0x19a   : > { %v748_v62 = vadd.f32 %v747_v51, %v687_v60 }
 0x19b   : > { %v1227_v0 = vrot.slane %v837_v59, 7 }
 0x19c   : > { %1781 = vmatmul.msk.bf16.gmra.mxu1 %vm634_vm2, %v2392_v37 }
 0x19d   : > { %1790 = vmatmul.msk.bf16.gmra.mxu2 %vm634_vm2, %v2392_v37  ;;  %1797 = vmatmul.msk.bf16.gmra.mxu3 %vm634_vm2, %v2392_v37  ;;  %v2502_v1 = vsel %vm1222_vm3, %v1226_v63, %v1227_v0 }
 0x1a0   : > { %v752_v2 = vpop.f32.mrf.mxu2  ;;  %v804_v3 = vpop.f32.mrf.mxu3 }
 0x1a1   : > { %v2504_v4 = vadd.f32 %v804_v3, %v743_v50  ;;  %v689_v5 = vpop.f32.mrf.mxu1 }
 0x1a2   : > { %v750_v6 = vadd.f32 %v749_v56, %v689_v5 }
 0x1a3   : > { %v1229_v15 = vrot.slane %v2504_v4, 7 }
 0x1a8   : > { %v754_v7 = vpop.f32.mrf.mxu2  ;;  %v806_v8 = vpop.f32.mrf.mxu3 }
 0x1a9   : > { %v839_v9 = vadd.f32 %v806_v8, %v745_v55  ;;  %v692_v11 = vpop.f32.mrf.mxu1 }
 0x1aa   : > { %v753_v12 = vadd.f32 %v752_v2, %v692_v11 }
 0x1ab   : > { %v1230_v16 = vrot.slane %v839_v9, 7  ;;  %v1412_v9 = vld [vmem:[%s2879_s5] sm:$0x3] }
 0x1ac   : > { %1782 = vmatmul.msk.bf16.gmra.mxu1 %vm634_vm2, %v2404_v49  ;;  %v1442_v11 = vsel %vm659_vm1, %v1412_v9, 0 }
 0x1ad   : > { %1791 = vmatmul.msk.bf16.gmra.mxu2 %vm634_vm2, %v2404_v49  ;;  %1798 = vmatmul.msk.bf16.gmra.mxu3 %vm634_vm2, %v2404_v49  ;;  %v2516_v17 = vsel %vm1222_vm3, %v1229_v15, %v1230_v16 }
 0x1ae   : > { %1451 = vmatpush.bf16.msra.mxu3 %v1442_v11 }
 0x1b0   : > { %v757_v18 = vpop.f32.mrf.mxu2  ;;  %v809_v19 = vpop.f32.mrf.mxu3 }
 0x1b1   : > { %v2518_v20 = vadd.f32 %v809_v19, %v748_v62  ;;  %v694_v21 = vpop.f32.mrf.mxu1 }
 0x1b2   : > { %v755_v22 = vadd.f32 %v754_v7, %v694_v21 }
 0x1b3   : > { %v1232_v30 = vrot.slane %v2518_v20, 7 }
 0x1b8   : > { %v759_v23 = vpop.f32.mrf.mxu2  ;;  %v811_v24 = vpop.f32.mrf.mxu3 }
 0x1b9   : > { %v841_v25 = vadd.f32 %v811_v24, %v750_v6  ;;  %v697_v27 = vpop.f32.mrf.mxu1 }
 0x1ba   : > { %v758_v29 = vadd.f32 %v757_v18, %v697_v27 }
 0x1bb   : > { %v1233_v31 = vrot.slane %v841_v25, 7 }
 0x1bc   : > { %1783 = vmatmul.msk.bf16.gmra.mxu1 %vm634_vm2, %v2416_v61 }
 0x1bd   : > { %1792 = vmatmul.msk.bf16.gmra.mxu2 %vm634_vm2, %v2416_v61  ;;  %1799 = vmatmul.msk.bf16.gmra.mxu3 %vm634_vm2, %v2416_v61  ;;  %v2530_v32 = vsel %vm1222_vm3, %v1232_v30, %v1233_v31 }
 0x1c0   : > { %v762_v33 = vpop.f32.mrf.mxu2  ;;  %v814_v34 = vpop.f32.mrf.mxu3 }
 0x1c1   : > { %v2532_v35 = vadd.f32 %v814_v34, %v753_v12  ;;  %v699_v36 = vpop.f32.mrf.mxu1 }
 0x1c2   : > { %v760_v38 = vadd.f32 %v759_v23, %v699_v36 }
 0x1c3   : > { %v1235_v45 = vrot.slane %v2532_v35, 7 }
 0x1c8   : > { %v764_v41 = vpop.f32.mrf.mxu2  ;;  %v816_v40 = vpop.f32.mrf.mxu3 }
 0x1c9   : > { %v843_v42 = vadd.f32 %v816_v40, %v755_v22  ;;  %v702_v43 = vpop.f32.mrf.mxu1 }
 0x1ca   : > { %v763_v44 = vadd.f32 %v762_v33, %v702_v43 }
 0x1cb   : > { %v1236_v46 = vrot.slane %v843_v42, 7 }
 0x1cc   : > { %1784 = vmatmul.msk.bf16.gmra.mxu1 %vm634_vm2, %v2432_v10 }
 0x1cd   : > { %1793 = vmatmul.msk.bf16.gmra.mxu2 %vm634_vm2, %v2432_v10  ;;  %1800 = vmatmul.msk.bf16.gmra.mxu3 %vm634_vm2, %v2432_v10  ;;  %v2544_v47 = vsel %vm1222_vm3, %v1235_v45, %v1236_v46 }
 0x1d0   : > { %v767_v48 = vpop.f32.mrf.mxu2  ;;  %v819_v50 = vpop.f32.mrf.mxu3 }
 0x1d1   : > { %v2546_v51 = vadd.f32 %v819_v50, %v758_v29  ;;  %v704_v52 = vpop.f32.mrf.mxu1 }
 0x1d2   : > { %v765_v54 = vadd.f32 %v764_v41, %v704_v52 }
 0x1d3   : > { %v1238_v62 = vrot.slane %v2546_v51, 7 }
 0x1d8   : > { %v769_v55 = vpop.f32.mrf.mxu2  ;;  %v821_v56 = vpop.f32.mrf.mxu3 }
 0x1d9   : > { %v845_v57 = vadd.f32 %v821_v56, %v760_v38  ;;  %v707_v59 = vpop.f32.mrf.mxu1 }
 0x1da   : > { %v768_v60 = vadd.f32 %v767_v48, %v707_v59 }
 0x1db   : > { %v1239_v0 = vrot.slane %v845_v57, 7 }
 0x1dc   : > { %1785 = vmatmul.msk.bf16.gmra.mxu1 %vm634_vm2, %v2452_v28 }
 0x1dd   : > { %1801 = vmatmul.msk.bf16.gmra.mxu3 %vm634_vm2, %v2452_v28  ;;  %1822 = vmatmul.msk.bf16.vlgmr.msra.gmra.mxu2 %vm634_vm2, %v2369_v14  ;;  %v2558_v2 = vsel %vm1222_vm3, %v1238_v62, %v1239_v0 }
 0x1e0   : > { %v824_v3 = vpop.f32.mrf.mxu3  ;;  %v918_v5 = vpop.f32.mrf.mxu2 }
 0x1e1   : > { %v2560_v6 = vadd.f32 %v824_v3, %v763_v44  ;;  %v709_v7 = vpop.f32.mrf.mxu1  ;;  %v1264_v3 = vsel %vm1222_vm3, 0.0, %v1226_v63 }
 0x1e2   : > { %v770_v8 = vadd.f32 %v769_v55, %v709_v7 }
 0x1e3   : > { %v1241_v22 = vrot.slane %v2560_v6, 7 }
 0x1e8   : > { %v826_v12 = vpop.f32.mrf.mxu3  ;;  %v920_v16 = vpop.f32.mrf.mxu2 }
 0x1e9   : > { %v847_v18 = vadd.f32 %v826_v12, %v765_v54  ;;  %v866_v19 = vpop.f32.mrf.mxu1 }
 0x1ea   : > { %v2566_v21 = vadd.f32 %v918_v5, %v866_v19 }
 0x1eb   : > { %v1242_v23 = vrot.slane %v847_v18, 7 }
 0x1ec   : > { %1813 = vmatmul.msk.bf16.vlgmr.msra.gmra.mxu1 %vm634_vm2, %v2367_v13 }
 0x1ed   : > { %1802 = vmatmul.msk.bf16.gmra.mxu3 %vm634_vm2, %v2464_v39  ;;  %1823 = vmatmul.msk.bf16.gmra.mxu2 %vm634_vm2, %v2380_v26  ;;  %v2578_v24 = vsel %vm1222_vm3, %v1241_v22, %v1242_v23 }
 0x1f0   : > { %v829_v25 = vpop.f32.mrf.mxu3  ;;  %v923_v27 = vpop.f32.mrf.mxu2 }
 0x1f1   : > { %v2580_v29 = vadd.f32 %v829_v25, %v768_v60  ;;  %v868_v31 = vpop.f32.mrf.mxu1  ;;  %v1265_v25 = vsel %vm1222_vm3, 0.0, %v1229_v15 }
 0x1f2   : > { %v2582_v33 = vadd.f32 %v920_v16, %v868_v31 }
 0x1f3   : > { %v1244_v40 = vrot.slane %v2580_v29, 7 }
 0x1f8   : > { %v831_v34 = vpop.f32.mrf.mxu3  ;;  %v925_v13 = vpop.f32.mrf.mxu2 }
 0x1f9   : > { %v849_v36 = vadd.f32 %v831_v34, %v770_v8  ;;  %v871_v38 = vpop.f32.mrf.mxu1 }
 0x1fa   : > { %v924_v41 = vadd.f32 %v923_v27, %v871_v38 }
 0x1fb   : > { %v1245_v42 = vrot.slane %v849_v36, 7 }
 0x1fc   : > { %1814 = vmatmul.msk.bf16.gmra.mxu1 %vm634_vm2, %v2355_v58  ;;  %v2602_v58 = vpop.f32.mrf.mxu0 }
 0x1fd   : > { %1824 = vmatmul.msk.bf16.gmra.mxu2 %vm634_vm2, %v2392_v37  ;;  %v2592_v43 = vsel %vm1222_vm3, %v1244_v40, %v1245_v42 }
 0x200   : > { %v928_v44 = vpop.f32.mrf.mxu2  ;;  %v2594_v46 = vpop.f32.mrf.mxu3 }
 0x201   : > { %v873_v48 = vpop.f32.mrf.mxu1 }
 0x202   : > { %v926_v50 = vadd.f32 %v925_v13, %v873_v48 }
 0x204   : > { %v2609_v11 = vpop.f32.mrf.mxu0 }
 0x208   : > { %v930_v52 = vpop.f32.mrf.mxu2  ;;  %v2596_v54 = vpop.f32.mrf.mxu3 }
 0x209   : > { %v876_v55 = vpop.f32.mrf.mxu1 }
 0x20a   : > { %v929_v56 = vadd.f32 %v928_v44, %v876_v55 }
 0x20c   : > { %1815 = vmatmul.msk.bf16.gmra.mxu1 %vm634_vm2, %v2369_v14  ;;  %v2621_v31 = vpop.f32.mrf.mxu0 }
 0x20d   : > { %1825 = vmatmul.msk.bf16.gmra.mxu2 %vm634_vm2, %v2404_v49 }
 0x210   : > { %v933_v57 = vpop.f32.mrf.mxu2  ;;  %v977_v59 = vpop.f32.mrf.mxu3 }
 0x211   : > { %v1014_v60 = vadd.f32 %v977_v59, %v924_v41  ;;  %v878_v0 = vpop.f32.mrf.mxu1 }
 0x212   : > { %v931_v5 = vadd.f32 %v930_v52, %v878_v0 }
 0x213   : > { %v2607_v7 = vadd.f32 %v1264_v3, %v1014_v60 }
 0x214   : > { %v2630_v42 = vpop.f32.mrf.mxu0 }
 0x218   : > { %v935_v8 = vpop.f32.mrf.mxu2  ;;  %v979_v9 = vpop.f32.mrf.mxu3 }
 0x219   : > { %v1015_v14 = vadd.f32 %v979_v9, %v926_v50  ;;  %v881_v12 = vpop.f32.mrf.mxu1  ;;  %v1266_v50 = vsel %vm1222_vm3, 0.0, %v1232_v30  ;;  %v1267_v9 = vsel %vm1222_vm3, 0.0, %v1235_v45 }
 0x21a   : > { %v934_v16 = vadd.f32 %v933_v57, %v881_v12 }
 0x21b   : > { %v2612_v18 = vadd.f32 %v2502_v1, %v1015_v14 }
 0x21c   : > { %1816 = vmatmul.msk.bf16.gmra.mxu1 %vm634_vm2, %v2380_v26 }
 0x21d   : > { %1826 = vmatmul.msk.bf16.gmra.mxu2 %vm634_vm2, %v2416_v61 }
 0x220   : > { %v938_v53 = vpop.f32.mrf.mxu2  ;;  %v982_v63 = vpop.f32.mrf.mxu3 }
 0x221   : > { %v1016_v19 = vadd.f32 %v982_v63, %v929_v56  ;;  %v883_v23 = vpop.f32.mrf.mxu1 }
 0x222   : > { %v936_v27 = vadd.f32 %v935_v8, %v883_v23 }
 0x223   : > { %v2623_v34 = vadd.f32 %v1265_v25, %v1016_v19 }
 0x228   : > { %v940_v1 = vpop.f32.mrf.mxu2  ;;  %v984_v13 = vpop.f32.mrf.mxu3 }
 0x229   : > { %v1017_v36 = vadd.f32 %v984_v13, %v931_v5  ;;  %v886_v26 = vpop.f32.mrf.mxu1 }
 0x22a   : > { %v939_v38 = vadd.f32 %v938_v53, %v886_v26 }
 0x22b   : > { %v2626_v41 = vadd.f32 %v2516_v17, %v1017_v36  ;;  %v794_v17 = vpop.f32.mrf.mxu0 }
 0x22c   : > { %1817 = vmatmul.msk.bf16.gmra.mxu1 %vm634_vm2, %v2392_v37 }
 0x22d   : > { %1827 = vmatmul.msk.bf16.gmra.mxu2 %vm634_vm2, %v2432_v10 }
 0x230   : > { %v943_v4 = vpop.f32.mrf.mxu2  ;;  %v987_v15 = vpop.f32.mrf.mxu3 }
 0x231   : > { %v1018_v44 = vadd.f32 %v987_v15, %v934_v16  ;;  %v888_v48 = vpop.f32.mrf.mxu1 }
 0x232   : > { %v941_v52 = vadd.f32 %v940_v1, %v888_v48 }
 0x233   : > { %v2637_v55 = vadd.f32 %v1266_v50, %v1018_v44  ;;  %v796_v3 = vpop.f32.mrf.mxu0  ;;  %v1269_v50 = vsel %vm1222_vm3, 0.0, %v1241_v22 }
 0x238   : > { %v945_v56 = vpop.f32.mrf.mxu2  ;;  %v989_v57 = vpop.f32.mrf.mxu3 }
 0x239   : > { %v1019_v37 = vadd.f32 %v989_v57, %v936_v27  ;;  %v891_v59 = vpop.f32.mrf.mxu1  ;;  %v1268_v27 = vsel %vm1222_vm3, 0.0, %v1238_v62 }
 0x23a   : > { %v944_v60 = vadd.f32 %v943_v4, %v891_v59 }
 0x23b   : > { %v2640_v0 = vadd.f32 %v2530_v32, %v1019_v37  ;;  %v1044_v19 = vpop.f32.mrf.mxu0 }
 0x23c   : > { %1818 = vmatmul.msk.bf16.gmra.mxu1 %vm634_vm2, %v2404_v49 }
 0x23d   : > { %1828 = vmatmul.msk.bf16.gmra.mxu2 %vm634_vm2, %v2452_v28 }
 0x240   : > { %v948_v20 = vpop.f32.mrf.mxu2  ;;  %v992_v30 = vpop.f32.mrf.mxu3 }
 0x241   : > { %v1020_v5 = vadd.f32 %v992_v30, %v939_v38  ;;  %v893_v8 = vpop.f32.mrf.mxu1  ;;  %v735_v30 = vadd.f32 %v2630_v42, %v2609_v11  ;;  %v1013_v11 = vadd.f32 %v2596_v54, %v2582_v33 }
 0x242   : > { %v946_v14 = vadd.f32 %v945_v56, %v893_v8 }
 0x243   : > { %v2649_v12 = vadd.f32 %v1267_v9, %v1020_v5  ;;  %v1046_v36 = vpop.f32.mrf.mxu0  ;;  %v835_v5 = vadd.f32 %v796_v3, %v735_v30 }
 0x248   : > { %v950_v32 = vpop.f32.mrf.mxu2  ;;  %v994_v16 = vpop.f32.mrf.mxu3 }
 0x249   : > { %v1021_v53 = vadd.f32 %v994_v16, %v941_v52  ;;  %v896_v63 = vpop.f32.mrf.mxu1 }
 0x24a   : > { %v949_v49 = vadd.f32 %v948_v20, %v896_v63  ;;  %v1270_v63 = vsel %vm1222_vm3, 0.0, %v1244_v40 }
 0x24b   : > { %v2652_v28 = vadd.f32 %v2544_v47, %v1021_v53  ;;  %v1224_v53 = vrot.slane %v835_v5, 7 }
 0x24c   : > { %1819 = vmatmul.msk.bf16.gmra.mxu1 %vm634_vm2, %v2416_v61 }
 0x24d   : > { %1829 = vmatmul.msk.bf16.gmra.mxu2 %vm634_vm2, %v2464_v39  ;;  %v1049_v39 = vpop.f32.mrf.mxu0 }
 0x250   : > { %v953_v35 = vpop.f32.mrf.mxu2  ;;  %v997_v45 = vpop.f32.mrf.mxu3 }
 0x251   : > { %v1022_v23 = vadd.f32 %v997_v45, %v944_v60  ;;  %v898_v25 = vpop.f32.mrf.mxu1 }
 0x252   : > { %v951_v1 = vadd.f32 %v950_v32, %v898_v25 }
 0x253   : > { %v2661_v13 = vadd.f32 %v1268_v27, %v1022_v23  ;;  %v2694_v23 = vld [vmem:[%s2878_s4] ss:$0 sm:$0xff] }
 0x255   : > { %v1051_v59 = vpop.f32.mrf.mxu0 }
 0x258   : > { %v955_v47 = vpop.f32.mrf.mxu2  ;;  %v999_v26 = vpop.f32.mrf.mxu3 }
 0x259   : > { %v1023_v38 = vadd.f32 %v999_v26, %v946_v14  ;;  %v901_v4 = vpop.f32.mrf.mxu1 }
 0x25a   : > { %v954_v61 = vadd.f32 %v953_v35, %v901_v4 }
 0x25b   : > { %v2664_v15 = vadd.f32 %v2558_v2, %v1023_v38 }
 0x25c   : > { %1820 = vmatmul.msk.bf16.gmra.mxu1 %vm634_vm2, %v2432_v10  ;;  %v733_v10 = vadd.f32 %v2621_v31, %v2602_v58 }
 0x25e   : > { %v834_v6 = vadd.f32 %v794_v17, %v733_v10 }
 0x260   : > { %v1002_v44 = vpop.f32.mrf.mxu3  ;;  %v1150_v51 = vpop.f32.mrf.mxu2  ;;  %v1223_v14 = vrot.slane %v834_v6, 7 }
 0x261   : > { %v1024_v48 = vadd.f32 %v1002_v44, %v949_v49  ;;  %v903_v62 = vpop.f32.mrf.mxu1  ;;  %v1012_v49 = vadd.f32 %v2594_v46, %v2566_v21 }
 0x262   : > { %v956_v52 = vadd.f32 %v955_v47, %v903_v62  ;;  %v1263_v3 = vsel %vm1222_vm3, 0.0, %v1223_v14 }
 0x263   : > { %v2671_v56 = vadd.f32 %v1269_v50, %v1024_v48  ;;  %v1271_v40 = vadd.f32 %v1263_v3, %v1012_v49 }
 0x268   : > { %v1004_v57 = vpop.f32.mrf.mxu3  ;;  %v1152_v37 = vpop.f32.mrf.mxu2 }
 0x269   : > { %v1025_v2 = vadd.f32 %v1004_v57, %v951_v1  ;;  %v1096_v60 = vpop.f32.mrf.mxu1 }
 0x26a   : > { %v1097_v22 = vadd.f32 %v1096_v60, %v1044_v19  ;;  %v1225_v19 = vsel %vm1222_vm3, %v1223_v14, %v1224_v53 }
 0x26b   : > { %v2676_v20 = vadd.f32 %v2578_v24, %v1025_v2  ;;  %v1054_v24 = vpop.f32.mrf.mxu0  ;;  %v1272_v45 = vadd.f32 %v1225_v19, %v1013_v11 }
 0x26c   : > { %v1190_v58 = vadd.f32 %v1150_v51, %v1097_v22 }
 0x26e   : > { %v1304_v29 = vrot.slane %v1190_v58, 1 }
 0x270   : > { %v1007_v8 = vpop.f32.mrf.mxu3  ;;  %v1155_v9 = vpop.f32.mrf.mxu2 }
 0x271   : > { %v1026_v32 = vadd.f32 %v1007_v8, %v954_v61  ;;  %v1098_v16 = vpop.f32.mrf.mxu1 }
 0x272   : > { %v1099_v31 = vadd.f32 %v1098_v16, %v1046_v36 }
 0x273   : > { %v2687_v42 = vadd.f32 %v1270_v63, %v1026_v32  ;;  %v1056_v4 = vpop.f32.mrf.mxu0 }
 0x274   : > { %v1191_v17 = vadd.f32 %v1152_v37, %v1099_v31 }
 0x276   : > { %v1305_v35 = vrot.slane %v1191_v17, 1 }
 0x278   : > { %v1306_v21 = vsel %vm1303_vm4, %v1304_v29, %v1305_v35  ;;  %v1344_v33 = vsel %vm1303_vm4, %v1305_v35, 0.0  ;;  %v1009_v46 = vpop.f32.mrf.mxu3  ;;  %v1157_v54 = vpop.f32.mrf.mxu2 }
 0x279   : > { %v1352_v25 = vadd.f32 %v1306_v21, %v1271_v40  ;;  %v1353_v27 = vadd.f32 %v1344_v33, %v1272_v45  ;;  %v1027_v1 = vadd.f32 %v1009_v46, %v956_v52  ;;  %v1101_v36 = vpop.f32.mrf.mxu1 }
 0x27a   : > { %v1102_v51 = vadd.f32 %v1101_v36, %v1049_v39 }
 0x27b   : > { %v1372_v47 = vadd.f32 %v2694_v23, %v1352_v25  ;;  %v1373_v26 = vadd.f32 %v2694_v23, %v1353_v27  ;;  %v2701_v38 = vadd.f32 %v2592_v43, %v1027_v1  ;;  %v1059_v10 = vpop.f32.mrf.mxu0 }
 0x27c   : > { %v1192_v57 = vadd.f32 %v1155_v9, %v1102_v51 }
 0x27d   : > { %v1388_v61 = vmax.f32 %v1372_v47, 0.0  ;;  %v1389_v44 = vmax.f32 %v1373_v26, 0.0 }
 0x27e   : > { %v1307_v2 = vrot.slane %v1192_v57, 1 }
 0x27f   : > { %v1404_v48 = vpack.c.bf16 %v1389_v44, %v1388_v61 }
 0x280   : > { %v1160_v62 = vpop.f32.mrf.mxu2 }
 0x281   : > { %v1103_v50 = vpop.f32.mrf.mxu1  ;;  %1830 = vmatmul.msk.bf16.vlgmr.msra.gmra.mxu3 %vm634_vm2, %v1404_v48 }
 0x282   : > { %v1104_v37 = vadd.f32 %v1103_v50, %v1051_v59 }
 0x283   : > { %v1061_v63 = vpop.f32.mrf.mxu0 }
 0x284   : > { %v1193_v52 = vadd.f32 %v1157_v54, %v1104_v37 }
 0x286   : > { %v1308_v60 = vrot.slane %v1193_v52, 1 }
 0x288   : > { %v1309_v30 = vsel %vm1303_vm4, %v1307_v2, %v1308_v60  ;;  %v1345_v43 = vsel %vm1303_vm4, %v1308_v60, 0.0  ;;  %v1162_v6 = vpop.f32.mrf.mxu2 }
 0x289   : > { %v1354_v5 = vadd.f32 %v1309_v30, %v2607_v7  ;;  %v1355_v39 = vadd.f32 %v1345_v43, %v2612_v18  ;;  %v1106_v22 = vpop.f32.mrf.mxu1 }
 0x28a   : > { %v1107_v32 = vadd.f32 %v1106_v22, %v1054_v24 }
 0x28b   : > { %v1375_v8 = vadd.f32 %v2694_v23, %v1355_v39  ;;  %v1374_v14 = vadd.f32 %v2694_v23, %v1354_v5  ;;  %v1064_v40 = vpop.f32.mrf.mxu0 }
 0x28c   : > { %v1194_v31 = vadd.f32 %v1160_v62, %v1107_v32 }
 0x28d   : > { %v1391_v9 = vmax.f32 %v1375_v8, 0.0  ;;  %v1390_v59 = vmax.f32 %v1374_v14, 0.0 }
 0x28e   : > { %v1310_v7 = vrot.slane %v1194_v31, 1 }
 0x28f   : > { %v1405_v16 = vpack.c.bf16 %v1391_v9, %v1390_v59 }
 0x290   : > { %v1165_v53 = vpop.f32.mrf.mxu2 }
 0x291   : > { %v1108_v58 = vpop.f32.mrf.mxu1  ;;  %1831 = vmatmul.msk.bf16.gmra.mxu3 %vm634_vm2, %v1405_v16 }
 0x292   : > { %v1109_v49 = vadd.f32 %v1108_v58, %v1056_v4 }
 0x294   : > { %v1195_v11 = vadd.f32 %v1162_v6, %v1109_v49 }
 0x296   : > { %v1311_v17 = vrot.slane %v1195_v11, 1 }
 0x298   : > { %v1312_v18 = vsel %vm1303_vm4, %v1310_v7, %v1311_v17  ;;  %v1346_v3 = vsel %vm1303_vm4, %v1311_v17, 0.0  ;;  %v1167_v19 = vpop.f32.mrf.mxu2 }
 0x299   : > { %v1356_v29 = vadd.f32 %v1312_v18, %v2623_v34  ;;  %v1357_v24 = vadd.f32 %v1346_v3, %v2626_v41  ;;  %v1111_v35 = vpop.f32.mrf.mxu1  ;;  %v1066_v34 = vpop.f32.mrf.mxu0 }
 0x29a   : > { %v1112_v54 = vadd.f32 %v1111_v35, %v1059_v10 }
 0x29b   : > { %v1377_v45 = vadd.f32 %v2694_v23, %v1357_v24  ;;  %v1376_v21 = vadd.f32 %v2694_v23, %v1356_v29 }
 0x29c   : > { %v1196_v36 = vadd.f32 %v1165_v53, %v1112_v54 }
 0x29d   : > { %v1393_v33 = vmax.f32 %v1377_v45, 0.0  ;;  %v1392_v46 = vmax.f32 %v1376_v21, 0.0 }
 0x29e   : > { %v1313_v4 = vrot.slane %v1196_v36, 1 }
 0x29f   : > { %v1406_v25 = vpack.c.bf16 %v1393_v33, %v1392_v46 }
 0x2a0   : > { %v1170_v27 = vpop.f32.mrf.mxu2 }
 0x2a1   : > { %v1113_v1 = vpop.f32.mrf.mxu1  ;;  %1832 = vmatmul.msk.bf16.gmra.mxu3 %vm634_vm2, %v1406_v25  ;;  %v1069_v10 = vpop.f32.mrf.mxu0 }
 0x2a2   : > { %v1114_v47 = vadd.f32 %v1113_v1, %v1061_v63 }
 0x2a4   : > { %v1197_v26 = vadd.f32 %v1167_v19, %v1114_v47 }
 0x2a6   : > { %v1314_v41 = vrot.slane %v1197_v26, 1 }
 0x2a8   : > { %v1315_v61 = vsel %vm1303_vm4, %v1313_v4, %v1314_v41  ;;  %v1347_v44 = vsel %vm1303_vm4, %v1314_v41, 0.0  ;;  %v1172_v51 = vpop.f32.mrf.mxu2 }
 0x2a9   : > { %v1358_v48 = vadd.f32 %v1315_v61, %v2637_v55  ;;  %v1359_v62 = vadd.f32 %v1347_v44, %v2640_v0  ;;  %v1116_v50 = vpop.f32.mrf.mxu1  ;;  %v1071_v9 = vpop.f32.mrf.mxu0 }
 0x2aa   : > { %v1117_v60 = vadd.f32 %v1116_v50, %v1064_v40 }
 0x2ab   : > { %v1379_v57 = vadd.f32 %v2694_v23, %v1359_v62  ;;  %v1378_v37 = vadd.f32 %v2694_v23, %v1358_v48 }
 0x2ac   : > { %v1198_v5 = vadd.f32 %v1170_v27, %v1117_v60 }
 0x2ad   : > { %v1395_v52 = vmax.f32 %v1379_v57, 0.0  ;;  %v1394_v2 = vmax.f32 %v1378_v37, 0.0 }
 0x2ae   : > { %v1316_v55 = vrot.slane %v1198_v5, 1 }
 0x2af   : > { %v1407_v30 = vpack.c.bf16 %v1395_v52, %v1394_v2 }
 0x2b0   : > { %v1175_v43 = vpop.f32.mrf.mxu2 }
 0x2b1   : > { %v1118_v6 = vpop.f32.mrf.mxu1  ;;  %1833 = vmatmul.msk.bf16.gmra.mxu3 %vm634_vm2, %v1407_v30  ;;  %v1074_v19 = vpop.f32.mrf.mxu0 }
 0x2b2   : > { %v1119_v39 = vadd.f32 %v1118_v6, %v1066_v34 }
 0x2b4   : > { %v1199_v22 = vadd.f32 %v1172_v51, %v1119_v39 }
 0x2b6   : > { %v1317_v8 = vrot.slane %v1199_v22, 1 }
 0x2b8   : > { %v1318_v0 = vsel %vm1303_vm4, %v1316_v55, %v1317_v8  ;;  %v1348_v14 = vsel %vm1303_vm4, %v1317_v8, 0.0  ;;  %v1177_v63 = vpop.f32.mrf.mxu2 }
 0x2b9   : > { %v1360_v59 = vadd.f32 %v1318_v0, %v2649_v12  ;;  %v1361_v32 = vadd.f32 %v1348_v14, %v2652_v28  ;;  %v1121_v16 = vpop.f32.mrf.mxu1  ;;  %v1076_v25 = vpop.f32.mrf.mxu0 }
 0x2ba   : > { %v1122_v11 = vadd.f32 %v1121_v16, %v1069_v10 }
 0x2bb   : > { %v1381_v53 = vadd.f32 %v2694_v23, %v1361_v32  ;;  %v1380_v58 = vadd.f32 %v2694_v23, %v1360_v59 }
 0x2bc   : > { %v1200_v18 = vadd.f32 %v1175_v43, %v1122_v11 }
 0x2bd   : > { %v1397_v31 = vmax.f32 %v1381_v53, 0.0  ;;  %v1396_v49 = vmax.f32 %v1380_v58, 0.0 }
 0x2be   : > { %v1319_v24 = vrot.slane %v1200_v18, 1 }
 0x2bf   : > { %v1408_v7 = vpack.c.bf16 %v1397_v31, %v1396_v49  ;;  %v383_v31 = vld [vmem:[%s2304_s23] sm:$0xff]  }
 0x2c0   : > { %v1180_v12 = vpop.f32.mrf.mxu2  ;;  %v2757_v49 = vld [vmem:[%s2880_s6] ss:$0 sm:$0xff]  ;;  %v1493_v11 = vunpack.c.l.bf16 %v383_v31  ;;  %v1494_v18 = vunpack.c.h.bf16 %v383_v31  ;;  %v393_v31 = vld [vmem:[%s2304_s23 + $0x28] sm:$0xff]  }
 0x2c1   : > { %v1123_v17 = vpop.f32.mrf.mxu1  ;;  %1834 = vmatmul.msk.bf16.gmra.mxu3 %vm634_vm2, %v1408_v7 }
 0x2c2   : > { %v1124_v3 = vadd.f32 %v1123_v17, %v1071_v9 }
 0x2c4   : > { %v1201_v29 = vadd.f32 %v1177_v63, %v1124_v3 }
 0x2c6   : > { %v1320_v28 = vrot.slane %v1201_v29, 1 }
 0x2c8   : > { %v1321_v35 = vsel %vm1303_vm4, %v1319_v24, %v1320_v28  ;;  %v1349_v40 = vsel %vm1303_vm4, %v1320_v28, 0.0  ;;  %v1182_v47 = vpop.f32.mrf.mxu2 }
 0x2c9   : > { %v1362_v45 = vadd.f32 %v1321_v35, %v2661_v13  ;;  %v1363_v21 = vadd.f32 %v1349_v40, %v2664_v15  ;;  %v1126_v33 = vpop.f32.mrf.mxu1  ;;  %v1079_v15 = vpop.f32.mrf.mxu0 }
 0x2ca   : > { %v1127_v36 = vadd.f32 %v1126_v33, %v1074_v19 }
 0x2cb   : > { %v1383_v46 = vadd.f32 %v2694_v23, %v1363_v21  ;;  %v1382_v54 = vadd.f32 %v2694_v23, %v1362_v45 }
 0x2cc   : > { %v1202_v4 = vadd.f32 %v1180_v12, %v1127_v36  ;;  %v385_v12 = vld [vmem:[%s2304_s23 + $0x8] sm:$0xff]   ;;  %v387_v36 = vld [vmem:[%s2304_s23 + $0x10] sm:$0xff]  }
 0x2cd   : > { %v1399_v27 = vmax.f32 %v1383_v46, 0.0  ;;  %v1398_v1 = vmax.f32 %v1382_v54, 0.0  ;;  %v1495_v35 = vunpack.c.l.bf16 %v385_v12  ;;  %v1496_v54 = vunpack.c.h.bf16 %v385_v12 }
 0x2ce   : > { %v1322_v13 = vrot.slane %v1202_v4, 1 }
 0x2cf   : > { %v1409_v26 = vpack.c.bf16 %v1399_v27, %v1398_v1 }
 0x2d0   : > { %v1185_v62 = vpop.f32.mrf.mxu2 }
 0x2d1   : > { %v1128_v34 = vpop.f32.mrf.mxu1  ;;  %1835 = vmatmul.msk.bf16.gmra.mxu3 %vm634_vm2, %v1409_v26  ;;  %v1081_v6 = vpop.f32.mrf.mxu0 }
 0x2d2   : > { %v1129_v41 = vadd.f32 %v1128_v34, %v1076_v25  ;;  %v1497_v34 = vunpack.c.l.bf16 %v387_v36 }
 0x2d4   : > { %v1203_v61 = vadd.f32 %v1182_v47, %v1129_v41 }
 0x2d6   : > { %v1323_v44 = vrot.slane %v1203_v61, 1 }
 0x2d8   : > { %v1324_v51 = vsel %vm1303_vm4, %v1322_v13, %v1323_v44  ;;  %v1350_v48 = vsel %vm1303_vm4, %v1323_v44, 0.0  ;;  %v1187_v55 = vpop.f32.mrf.mxu2 }
 0x2d9   : > { %v1364_v50 = vadd.f32 %v1324_v51, %v2671_v56  ;;  %v1365_v57 = vadd.f32 %v1350_v48, %v2676_v20  ;;  %v1131_v37 = vpop.f32.mrf.mxu1 }
 0x2da   : > { %v1132_v30 = vadd.f32 %v1131_v37, %v1079_v15  ;;  %v1498_v15 = vunpack.c.h.bf16 %v387_v36 }
 0x2db   : > { %v1385_v52 = vadd.f32 %v2694_v23, %v1365_v57  ;;  %v1384_v2 = vadd.f32 %v2694_v23, %v1364_v50  ;;  %v389_v50 = vld [vmem:[%s2304_s23 + $0x18] sm:$0xff]  }
 0x2dc   : > { %v1204_v39 = vadd.f32 %v1185_v62, %v1132_v30 }
 0x2dd   : > { %v1401_v60 = vmax.f32 %v1385_v52, 0.0  ;;  %v1400_v10 = vmax.f32 %v1384_v2, 0.0  ;;  %v1499_v52 = vunpack.c.l.bf16 %v389_v50 }
 0x2de   : > { %v1325_v20 = vrot.slane %v1204_v39, 1 }
 0x2df   : > { %v1410_v43 = vpack.c.bf16 %v1401_v60, %v1400_v10 }
 0x2e1   : > { %v1133_v5 = vpop.f32.mrf.mxu1  ;;  %1836 = vmatmul.msk.bf16.gmra.mxu3 %vm634_vm2, %v1410_v43 }
 0x2e2   : > { %v1134_v22 = vadd.f32 %v1133_v5, %v1081_v6  ;;  %v1500_v6 = vunpack.c.h.bf16 %v389_v50 }
 0x2e4   : > { %v1205_v56 = vadd.f32 %v1187_v55, %v1134_v22  ;;  %v391_v55 = vld [vmem:[%s2304_s23 + $0x20] sm:$0xff]  }
 0x2e6   : > { %v1326_v8 = vrot.slane %v1205_v56, 1 }
 0x2e8   : > { %v1327_v0 = vsel %vm1303_vm4, %v1325_v20, %v1326_v8  ;;  %v1351_v14 = vsel %vm1303_vm4, %v1326_v8, 0.0  ;;  %v1501_v8 = vunpack.c.l.bf16 %v391_v55 }
 0x2e9   : > { %v1366_v9 = vadd.f32 %v1327_v0, %v2687_v42  ;;  %v1367_v59 = vadd.f32 %v1351_v14, %v2701_v38 }
 0x2eb   : > { %v1387_v32 = vadd.f32 %v2694_v23, %v1367_v59  ;;  %v1386_v16 = vadd.f32 %v2694_v23, %v1366_v9 }
 0x2ed   : > { %v1403_v53 = vmax.f32 %v1387_v32, 0.0  ;;  %v1402_v63 = vmax.f32 %v1386_v16, 0.0  ;;  %v1502_v16 = vunpack.c.h.bf16 %v391_v55 }
 0x2ef   : > { %v1411_v58 = vpack.c.bf16 %v1403_v53, %v1402_v63 }
 0x2f1   : > { %1837 = vmatmul.msk.bf16.gmra.mxu3 %vm634_vm2, %v1411_v58 }
 0x304   : > { %v1453_v42 = vpop.f32.mrf.mxu3 }
 0x305   : > { %v1454_v38 = vadd.f32 %v2757_v49, %v1453_v42 }
 0x307   : > { %v1509_v23 = vadd.f32 %v1493_v11, %v1454_v38  ;;  %v1503_v38 = vunpack.c.l.bf16 %v393_v31 }
 0x309   : > { %v1525_v7 = vmax.f32 %v1509_v23, 0.0 }
 0x30b   : > { %v1541_v17 = vpack.c.bf16 %v1525_v7, %v1525_v7 }
 0x30c   : > { %v1455_v3 = vpop.f32.mrf.mxu3 }
 0x30d   : > { %1558 = vst.msk [vmem:[%s2763_s27] sm:$0xf] %vm1557_vm5, %v1541_v17  ;;  %v1456_v19 = vadd.f32 %v2757_v49, %v1455_v3 }
 0x30f   : > { %v1510_v29 = vadd.f32 %v1494_v18, %v1456_v19  ;;  %v1504_v19 = vunpack.c.h.bf16 %v393_v31 }
 0x311   : > { %v1526_v24 = vmax.f32 %v1510_v29, 0.0 }
 0x313   : > { %v1542_v28 = vpack.c.bf16 %v1526_v24, %v1526_v24 }
 0x314   : > { %v1458_v40 = vpop.f32.mrf.mxu3 }
 0x315   : > { %1559 = vst.msk [vmem:[%s2763_s27 + $0x4] sm:$0xf] %vm1557_vm5, %v1542_v28  ;;  %v1459_v45 = vadd.f32 %v2757_v49, %v1458_v40  ;;  %v395_v28 = vld [vmem:[%s2304_s23 + $0x30] sm:$0xff]  }
 0x317   : > { %v1511_v21 = vadd.f32 %v1495_v35, %v1459_v45  ;;  %v1505_v45 = vunpack.c.l.bf16 %v395_v28 }
 0x319   : > { %v1527_v33 = vmax.f32 %v1511_v21, 0.0 }
 0x31b   : > { %v1543_v46 = vpack.c.bf16 %v1527_v33, %v1527_v33 }
 0x31c   : > { %v1460_v25 = vpop.f32.mrf.mxu3 }
 0x31d   : > { %1560 = vst.msk [vmem:[%s2763_s27 + $0x8] sm:$0xf] %vm1557_vm5, %v1543_v46  ;;  %v1461_v27 = vadd.f32 %v2757_v49, %v1460_v25 }
 0x31f   : > { %v1512_v1 = vadd.f32 %v1496_v54, %v1461_v27  ;;  %v1506_v27 = vunpack.c.h.bf16 %v395_v28 }
 0x321   : > { %v1528_v47 = vmax.f32 %v1512_v1, 0.0 }
 0x323   : > { %v1544_v26 = vpack.c.bf16 %v1528_v47, %v1528_v47 }
 0x324   : > { %v1463_v4 = vpop.f32.mrf.mxu3 }
 0x325   : > { %1561 = vst.msk [vmem:[%s2763_s27 + $0xc] sm:$0xf] %vm1557_vm5, %v1544_v26  ;;  %v1464_v41 = vadd.f32 %v2757_v49, %v1463_v4  ;;  %v397_v26 = vld [vmem:[%s2304_s23 + $0x38] sm:$0xff]  }
 0x327   : > { %v1513_v61 = vadd.f32 %v1497_v34, %v1464_v41  ;;  %v1507_v41 = vunpack.c.l.bf16 %v397_v26 }
 0x329   : > { %v1529_v13 = vmax.f32 %v1513_v61, 0.0 }
 0x32b   : > { %v1545_v44 = vpack.c.bf16 %v1529_v13, %v1529_v13 }
 0x32c   : > { %v1465_v51 = vpop.f32.mrf.mxu3 }
 0x32d   : > { %1562 = vst.msk [vmem:[%s2763_s27 + $0x10] sm:$0xf] %vm1557_vm5, %v1545_v44  ;;  %v1466_v48 = vadd.f32 %v2757_v49, %v1465_v51 }
 0x32f   : > { %v1514_v62 = vadd.f32 %v1498_v15, %v1466_v48  ;;  %v1508_v48 = vunpack.c.h.bf16 %v397_v26 }
 0x331   : > { %v1530_v57 = vmax.f32 %v1514_v62, 0.0 }
 0x333   : > { %v1546_v37 = vpack.c.bf16 %v1530_v57, %v1530_v57 }
 0x334   : > { %v1468_v2 = vpop.f32.mrf.mxu3 }
 0x335   : > { %1563 = vst.msk [vmem:[%s2763_s27 + $0x14] sm:$0xf] %vm1557_vm5, %v1546_v37  ;;  %v1469_v60 = vadd.f32 %v2757_v49, %v1468_v2 }
 0x337   : > { %v1515_v10 = vadd.f32 %v1499_v52, %v1469_v60 }
 0x339   : > { %v1531_v30 = vmax.f32 %v1515_v10, 0.0 }
 0x33b   : > { %v1547_v43 = vpack.c.bf16 %v1531_v30, %v1531_v30 }
 0x33c   : > { %v1470_v5 = vpop.f32.mrf.mxu3 }
 0x33d   : > { %1564 = vst.msk [vmem:[%s2763_s27 + $0x18] sm:$0xf] %vm1557_vm5, %v1547_v43  ;;  %v1471_v39 = vadd.f32 %v2757_v49, %v1470_v5 }
 0x33f   : > { %v1516_v22 = vadd.f32 %v1500_v6, %v1471_v39 }
 0x341   : > { %v1532_v56 = vmax.f32 %v1516_v22, 0.0 }
 0x343   : > { %v1548_v20 = vpack.c.bf16 %v1532_v56, %v1532_v56 }
 0x344   : > { %v1473_v0 = vpop.f32.mrf.mxu3 }
 0x345   : > { %1565 = vst.msk [vmem:[%s2763_s27 + $0x1c] sm:$0xf] %vm1557_vm5, %v1548_v20  ;;  %v1474_v14 = vadd.f32 %v2757_v49, %v1473_v0 }
 0x347   : > { %v1517_v9 = vadd.f32 %v1501_v8, %v1474_v14 }
 0x349   : > { %v1533_v59 = vmax.f32 %v1517_v9, 0.0 }
 0x34b   : > { %v1549_v32 = vpack.c.bf16 %v1533_v59, %v1533_v59 }
 0x34c   : > { %v1475_v53 = vpop.f32.mrf.mxu3 }
 0x34d   : > { %1566 = vst.msk [vmem:[%s2763_s27 + $0x20] sm:$0xf] %vm1557_vm5, %v1549_v32  ;;  %v1476_v63 = vadd.f32 %v2757_v49, %v1475_v53 }
 0x34f   : > { %v1518_v58 = vadd.f32 %v1502_v16, %v1476_v63 }
 0x351   : > { %v1534_v11 = vmax.f32 %v1518_v58, 0.0 }
 0x353   : > { %v1550_v42 = vpack.c.bf16 %v1534_v11, %v1534_v11 }
 0x354   : > { %v1478_v23 = vpop.f32.mrf.mxu3 }
 0x355   : > { %1567 = vst.msk [vmem:[%s2763_s27 + $0x24] sm:$0xf] %vm1557_vm5, %v1550_v42  ;;  %v1479_v7 = vadd.f32 %v2757_v49, %v1478_v23 }
 0x357   : > { %v1519_v17 = vadd.f32 %v1503_v38, %v1479_v7 }
 0x359   : > { %v1535_v18 = vmax.f32 %v1519_v17, 0.0 }
 0x35b   : > { %v1551_v3 = vpack.c.bf16 %v1535_v18, %v1535_v18 }
 0x35c   : > { %v1480_v29 = vpop.f32.mrf.mxu3 }
 0x35d   : > { %1568 = vst.msk [vmem:[%s2763_s27 + $0x28] sm:$0xf] %vm1557_vm5, %v1551_v3  ;;  %v1481_v12 = vadd.f32 %v2757_v49, %v1480_v29 }
 0x35f   : > { %v1520_v24 = vadd.f32 %v1504_v19, %v1481_v12 }
 0x361   : > { %v1536_v35 = vmax.f32 %v1520_v24, 0.0 }
 0x363   : > { %v1552_v40 = vpack.c.bf16 %v1536_v35, %v1536_v35 }
 0x364   : > { %v1483_v21 = vpop.f32.mrf.mxu3 }
 0x365   : > { %1569 = vst.msk [vmem:[%s2763_s27 + $0x2c] sm:$0xf] %vm1557_vm5, %v1552_v40  ;;  %v1484_v33 = vadd.f32 %v2757_v49, %v1483_v21 }
 0x367   : > { %v1521_v46 = vadd.f32 %v1505_v45, %v1484_v33 }
 0x369   : > { %v1537_v54 = vmax.f32 %v1521_v46, 0.0 }
 0x36b   : > { %v1553_v25 = vpack.c.bf16 %v1537_v54, %v1537_v54 }
 0x36c   : > { %v1485_v1 = vpop.f32.mrf.mxu3 }
 0x36d   : > { %1570 = vst.msk [vmem:[%s2763_s27 + $0x30] sm:$0xf] %vm1557_vm5, %v1553_v25  ;;  %v1486_v36 = vadd.f32 %v2757_v49, %v1485_v1 }
 0x36f   : > { %v1522_v47 = vadd.f32 %v1506_v27, %v1486_v36 }
 0x371   : > { %v1538_v34 = vmax.f32 %v1522_v47, 0.0 }
 0x373   : > { %v1554_v4 = vpack.c.bf16 %v1538_v34, %v1538_v34 }
 0x374   : > { %v1488_v61 = vpop.f32.mrf.mxu3 }
 0x375   : > { %1571 = vst.msk [vmem:[%s2763_s27 + $0x34] sm:$0xf] %vm1557_vm5, %v1554_v4  ;;  %v1489_v13 = vadd.f32 %v2757_v49, %v1488_v61 }
 0x377   : > { %v1523_v44 = vadd.f32 %v1507_v41, %v1489_v13 }
 0x379   : > { %v1539_v15 = vmax.f32 %v1523_v44, 0.0 }
 0x37b   : > { %v1555_v51 = vpack.c.bf16 %v1539_v15, %v1539_v15 }
 0x37c   : > { %v1490_v62 = vpop.f32.mrf.mxu3 }
 0x37d   : > { %1572 = vst.msk [vmem:[%s2763_s27 + $0x38] sm:$0xf] %vm1557_vm5, %v1555_v51  ;;  %v1491_v50 = vadd.f32 %v2757_v49, %v1490_v62 }
 0x37f   : > { %v1524_v57 = vadd.f32 %v1508_v48, %v1491_v50 }
 0x381   : > { %v1540_v37 = vmax.f32 %v1524_v57, 0.0 }
 0x383   : > { %v1556_v52 = vpack.c.bf16 %v1540_v37, %v1540_v37 }
 0x385   : > { %1573 = vst.msk [vmem:[%s2763_s27 + $0x3c] sm:$0xf] %vm1557_vm5, %v1556_v52 }
 0x386   : > { %2037 = shalt.err (!%p2034_p3)
}
 0x387   : > { %s2136_s14 = smov 64   ;;  %s2137_s27 = smov 4  }
 0x388   : > { %1873 = dma.vmem_to_hbm [thread:$0]  (%p2260_p12), %s1591_s13, 1024, %s1593_s19, %s1575_s15, %s2136_s14, %s2136_s14, %s2137_s27  }
 0x389 PF: > { %p1884_p9 = scmp.ge.s32.totalorder %s2132_s11, 2  ;;  %s1607_s23 = sand.u32 1, %s2092_s24  }
 0x38a   : > { %s1608_s20 = scalar_lea.sflag [#allocation4], %s1607_s23 }
 0x38b   : > { %p1880_p7 = pnand %p1884_p9, %p2273_p2 }
 0x38d   : > { %p1881_p10 = pneg %p1880_p7 }
 0x38f   : > { %2087 = dma.done.wait (%p1881_p10), %s1608_s20, 1024  }
 0x390   : > { %2089 = vsyncadd (%p1881_p10), %s1608_s20, 4294966272  ;;  %s23_s11 = sadd.s32 1, %s2132_s11   ;;  %s2905_s30 = sld [smem:[#allocation14_spill]] }
 0x391   : > { %p20_p11 = scmp.ge.s32.totalorder %s23_s11, 6   ;;  %s2906_s8 = sld [smem:[#allocation13_spill]] }
 0x392   : > { %s2907_s13 = sld [smem:[#allocation8_spill]]  ;;  %s2911_s24 = smov %s2096_s25 }
 0x393   : > { %s2908_s19 = sld [smem:[#allocation9_spill]]  ;;  %s2912_s25 = smov %s2100_s26 }
 0x394   : > { %s2909_s9 = sld [smem:[#allocation10_spill]]  ;;  %s2914_s27 = smov %s2108_s28 }
 0x395   : > { %s2910_s10 = sld [smem:[#allocation11_spill]]  ;;  %s2915_s28 = smov %s2112_s29 }
 0x396   : > { %s2913_s26 = smov %s2905_s30  ;;  %22 = sbr.rel (!%p20_p11) target bundleno = 11 (0xb), region = 104 }
 0x397   : > { %s2916_s29 = smov %s2906_s8 }
 0x398   : > { %s2917_s30 = smov %s2907_s13 }
 0x399   : > { %s2918_s8 = smov %s2908_s19 }
 0x39b   :  { %1614 = vsyncpa [#allocation3], 1 }
 0x39c   :  { %1616 = vsyncpa [#allocation3 + $0x1], 1 }
 0x39d   :  { %1617 = vsyncpa [#allocation4], 1 }
 0x39e   :  { %1619 = vsyncpa [#allocation4 + $0x1], 1 }

</bundles_post_ra>
